<compile_context>
chip_gen: v5e
topology: v5e:2x2
jax: 0.10.0
libtpu: 0.0.40
codegen_flags: <defaults>
</compile_context>

<pallas_src>
import functools

import jax
import jax.numpy as jnp
import numpy as np
from jax.experimental import pallas as pl
from jax.experimental.pallas import tpu as pltpu


# ----------------------------- Pallas kernel ------------------------------ #

def _relpos_kernel(q_ref, k_ref, wg_ref, hg_ref, o_ref, *, H, W):
    # q_ref : (1, 1, HW, D)   queries of one (b, n), spatially flattened
    # k_ref : (1, 1, HW, D)   keys of one (b, n), spatially flattened
    # wg_ref: (W, W, D)       wg[y, Y, :] = w_emb[Y - y + W - 1]
    # hg_ref: (H, H, D)       hg[x, X, :] = h_emb[X - x + H - 1]
    # o_ref : (1, 1, HW, HW)  logits for this (b, n); keys flattened as X*W+Y
    HW = H * W
    D = q_ref.shape[-1]

    q2 = q_ref[0, 0]                     # (HW, D)
    k2 = k_ref[0, 0]                     # (HW, D)

    # Content term: one big MXU matmul (M = HW, K = D, N = HW).
    dn = (((1,), (1,)), ((), ()))        # contract head_dim of both operands
    content = jax.lax.dot_general(q2, k2, dn,
                                  preferred_element_type=jnp.float32)  # (HW, HW)

    # Relative terms: D-contractions on the MXU as batched matmuls against the
    # un-broadcast gathers.  The results are D-free and tiny; only they get
    # broadcast into the (HW, HW) output.
    q3 = q2.reshape(H, W, D)             # (H, W, D)
    th = jnp.einsum('xwd,xXd->xwX', q3, hg_ref[...],
                    preferred_element_type=jnp.float32)                # (H, W, H)
    tw = jnp.einsum('xwd,wYd->xwY', q3, wg_ref[...],
                    preferred_element_type=jnp.float32)                # (H, W, W)

    th2 = th.reshape(HW, H)              # row r = x*W + y, column X
    tw2 = tw.reshape(HW, W)              # row r = x*W + y, column Y
    # rel[r, X*W + Y] = th2[r, X] + tw2[r, Y]
    rel = (th2[:, :, None] + tw2[:, None, :]).reshape(HW, HW)

    o_ref[0, 0] = (content + rel).astype(o_ref.dtype)


def relative_pos_emb_forward(q, k, w_emb, h_emb):
    """q, k: (B, N, H, W, D); w_emb: (2W-1, D); h_emb: (2H-1, D)."""
    B, N, H, W, D = q.shape
    HW = H * W

    # Plain-JAX glue: the rel->abs pad/reshape trick realized as a static
    # gather over embedding rows (no spatial replication).
    yy = jnp.arange(W)
    w_gather = w_emb[yy[None, :] - yy[:, None] + W - 1]      # (W, W, D)  [y, Y, d]
    xx = jnp.arange(H)
    h_gather = h_emb[xx[None, :] - xx[:, None] + H - 1]      # (H, H, D)  [x, X, d]

    q_flat = q.reshape(B, N, HW, D)
    k_flat = k.reshape(B, N, HW, D)

    kernel = functools.partial(_relpos_kernel, H=H, W=W)

    out_flat = pl.pallas_call(
        kernel,
        out_shape=jax.ShapeDtypeStruct((B, N, HW, HW), q.dtype),
        grid_spec=pltpu.PrefetchScalarGridSpec(
            num_scalar_prefetch=0,
            grid=(B, N),
            in_specs=[
                pl.BlockSpec((1, 1, HW, D), lambda b, n: (b, n, 0, 0)),
                pl.BlockSpec((1, 1, HW, D), lambda b, n: (b, n, 0, 0)),
                pl.BlockSpec((W, W, D), lambda b, n: (0, 0, 0)),
                pl.BlockSpec((H, H, D), lambda b, n: (0, 0, 0)),
            ],
            out_specs=pl.BlockSpec((1, 1, HW, HW),
                                   lambda b, n: (b, n, 0, 0)),
        ),
        compiler_params=pltpu.CompilerParams(
            dimension_semantics=("parallel", "parallel")),
    )(q_flat, k_flat, w_gather, h_gather)

    return out_flat.reshape(B, N, H, W, H, W)


# ------------------------ pure-JAX reference (check) ----------------------- #

def _rel_to_abs_ref(rel):
    bs, heads, L, _ = rel.shape
    col_pad = jnp.zeros((bs, heads, L, 1), rel.dtype)
    x = jnp.concatenate([rel, col_pad], axis=3)
    flat = x.reshape(bs, heads, -1)
    flat_pad = jnp.zeros((bs, heads, L - 1), x.dtype)
    flat2 = jnp.concatenate([flat, flat_pad], axis=2)
    final = flat2.reshape(bs, heads, L + 1, 2 * L - 1)
    return final[:, :, :L, L - 1:]


def _relative_logits_1d_ref(q, kemb, transpose_mask):
    b, heads, h, w, d = q.shape
    rel = jnp.einsum('bhxyd,md->bhxym', q, kemb)
    rel = rel.reshape(-1, heads * h, w, 2 * w - 1)
    rel = _rel_to_abs_ref(rel)
    rel = rel.reshape(-1, heads, h, w, w)
    rel = jnp.expand_dims(rel, 3)
    rel = jnp.tile(rel, (1, 1, 1, h, 1, 1))
    return jnp.transpose(rel, transpose_mask)


def _relative_logits_ref(w_emb, h_emb, q):
    rel_w = _relative_logits_1d_ref(q, w_emb, (0, 1, 2, 4, 3, 5))
    rel_h = _relative_logits_1d_ref(jnp.transpose(q, (0, 1, 3, 2, 4)),
                                    h_emb, (0, 1, 4, 2, 5, 3))
    return rel_w + rel_h


def _forward_ref(q, k, w_emb, h_emb):
    logits = jnp.einsum('bnhwd,bnpqd->bnhwpq', q, k)
    return logits + _relative_logits_ref(w_emb, h_emb, q)


# ---------------------------------- main ----------------------------------- #

if __name__ == "__main__":
    B, N, H, W, D = 2, 4, 8, 8, 16          # batch, heads, fmap h, fmap w, head_dim
    scale = D ** (-0.5)

    key = jax.random.PRNGKey(0)
    kq, kk, kw, kh = jax.random.split(key, 4)
    q = jax.random.normal(kq, (B, N, H, W, D), dtype=jnp.float32)
    k = jax.random.normal(kk, (B, N, H, W, D), dtype=jnp.float32)
    # nn.init.normal_(param, self.scale) == normal(mean=scale, std=1.0)
    w_emb = scale + jax.random.normal(kw, (2 * W - 1, D), dtype=jnp.float32)
    h_emb = scale + jax.random.normal(kh, (2 * H - 1, D), dtype=jnp.float32)

    out = relative_pos_emb_forward(q, k, w_emb, h_emb)
    out = jax.block_until_ready(out)

    ref = _forward_ref(q, k, w_emb, h_emb)
    # Tightened from 5e-2; slack left only for possible MXU-vs-XLA default
    # f32 matmul precision (bf16-pass) differences.
    np.testing.assert_allclose(np.asarray(out), np.asarray(ref),
                               rtol=2e-2, atol=2e-2)

    print("KERNEL_OK")
</pallas_src>

<mosaic_0001>
module attributes {stable_mosaic.version = 11 : i64} {
  func.func @_relpos_kernel(%arg0: i32, %arg1: i32, %arg2: memref<1x1x64x16xf32, #tpu.memory_space<vmem>>, %arg3: memref<1x1x64x16xf32, #tpu.memory_space<vmem>>, %arg4: memref<8x8x16xf32, #tpu.memory_space<vmem>>, %arg5: memref<8x8x16xf32, #tpu.memory_space<vmem>>, %arg6: memref<1x1x64x64xf32, #tpu.memory_space<vmem>>) attributes {dimension_semantics = [#tpu.dimension_semantics<parallel>, #tpu.dimension_semantics<parallel>], iteration_bounds = array<i64: 2, 4>, scalar_prefetch = 0 : i64, scratch_operands = 0 : i64, tpu.core_type = #tpu.core_type<tc>, window_params = [{transform_indices = @transform_0, window_bounds = array<i64: 1, 1, 64, 16>}, {transform_indices = @transform_1, window_bounds = array<i64: 1, 1, 64, 16>}, {pipeline_mode = #tpu.pipeline_mode<synchronous>, transform_indices = @transform_2, window_bounds = array<i64: 8, 8, 16>}, {pipeline_mode = #tpu.pipeline_mode<synchronous>, transform_indices = @transform_3, window_bounds = array<i64: 8, 8, 16>}, {transform_indices = @transform_4, window_bounds = array<i64: 1, 1, 64, 64>}]} {
    %c0 = arith.constant 0 : index
    %c0_0 = arith.constant 0 : index
    %c0_1 = arith.constant 0 : index
    %c0_2 = arith.constant 0 : index
    %0 = vector.load %arg2[%c0, %c0_0, %c0_1, %c0_2] : memref<1x1x64x16xf32, #tpu.memory_space<vmem>>, vector<1x1x64x16xf32>
    %1 = vector.shape_cast %0 : vector<1x1x64x16xf32> to vector<64x16xf32>
    %c0_3 = arith.constant 0 : index
    %c0_4 = arith.constant 0 : index
    %c0_5 = arith.constant 0 : index
    %c0_6 = arith.constant 0 : index
    %2 = vector.load %arg3[%c0_3, %c0_4, %c0_5, %c0_6] : memref<1x1x64x16xf32, #tpu.memory_space<vmem>>, vector<1x1x64x16xf32>
    %3 = vector.shape_cast %2 : vector<1x1x64x16xf32> to vector<64x16xf32>
    %cst = arith.constant dense<0.000000e+00> : vector<64x64xf32>
    %4 = tpu.matmul %1, %3, %cst {dimension_numbers = #tpu.dot_dimension_numbers<[1], [1], [0], [0], [0, 0, 1, 0], [], []>} : vector<64x16xf32>, vector<64x16xf32>, vector<64x64xf32> -> vector<64x64xf32>
    %5 = vector.shape_cast %1 : vector<64x16xf32> to vector<8x8x16xf32>
    %c0_7 = arith.constant 0 : index
    %c0_8 = arith.constant 0 : index
    %c0_9 = arith.constant 0 : index
    %6 = vector.load %arg5[%c0_7, %c0_8, %c0_9] : memref<8x8x16xf32, #tpu.memory_space<vmem>>, vector<8x8x16xf32>
    "tpu.trace_start"() <{level = 10 : i32, message = "xwd,xXd->xwX"}> : () -> ()
    %cst_10 = arith.constant dense<0.000000e+00> : vector<8x8x8xf32>
    %7 = tpu.matmul %5, %6, %cst_10 {dimension_numbers = #tpu.dot_dimension_numbers<[2], [2], [1], [1], [0, 0, 0, 1, 1, 1], [0], [0]>} : vector<8x8x16xf32>, vector<8x8x16xf32>, vector<8x8x8xf32> -> vector<8x8x8xf32>
    "tpu.trace_stop"() : () -> ()
    %c0_11 = arith.constant 0 : index
    %c0_12 = arith.constant 0 : index
    %c0_13 = arith.constant 0 : index
    %8 = vector.load %arg4[%c0_11, %c0_12, %c0_13] : memref<8x8x16xf32, #tpu.memory_space<vmem>>, vector<8x8x16xf32>
    "tpu.trace_start"() <{level = 10 : i32, message = "xwd,wYd->xwY"}> : () -> ()
    %cst_14 = arith.constant dense<0.000000e+00> : vector<8x8x8xf32>
    %9 = tpu.matmul %8, %5, %cst_14 {dimension_numbers = #tpu.dot_dimension_numbers<[2], [2], [1], [0], [0, 0, 0, 1, 1, 0], [0], [1]>} : vector<8x8x16xf32>, vector<8x8x16xf32>, vector<8x8x8xf32> -> vector<8x8x8xf32>
    %10 = tpu.transpose %9, [2, 0, 1] : vector<8x8x8xf32> -> vector<8x8x8xf32>
    "tpu.trace_stop"() : () -> ()
    %11 = vector.shape_cast %7 : vector<8x8x8xf32> to vector<64x8xf32>
    %12 = vector.shape_cast %10 : vector<8x8x8xf32> to vector<64x8xf32>
    %13 = vector.shape_cast %11 : vector<64x8xf32> to vector<64x8x1xf32>
    %14 = vector.shape_cast %12 : vector<64x8xf32> to vector<64x1x8xf32>
    %15 = vector.broadcast %13 : vector<64x8x1xf32> to vector<64x8x8xf32>
    %16 = vector.broadcast %14 : vector<64x1x8xf32> to vector<64x8x8xf32>
    %17 = arith.addf %15, %16 : vector<64x8x8xf32>
    %18 = vector.shape_cast %17 : vector<64x8x8xf32> to vector<64x64xf32>
    %19 = arith.addf %4, %18 : vector<64x64xf32>
    %c0_15 = arith.constant 0 : index
    %c0_16 = arith.constant 0 : index
    %c0_17 = arith.constant 0 : index
    %c0_18 = arith.constant 0 : index
    %20 = vector.load %arg6[%c0_15, %c0_16, %c0_17, %c0_18] : memref<1x1x64x64xf32, #tpu.memory_space<vmem>>, vector<1x1x64x64xf32>
    %21 = vector.shape_cast %20 : vector<1x1x64x64xf32> to vector<64x64xf32>
    %22 = vector.shape_cast %19 : vector<64x64xf32> to vector<1x1x64x64xf32>
    tpu.vector_store %arg6[%c0_15, %c0_16, %c0_17, %c0_18], %22 {strides = array<i32>} : memref<1x1x64x64xf32, #tpu.memory_space<vmem>>, vector<1x1x64x64xf32>,
    return
  }
  func.func @transform_0(%arg0: i32, %arg1: i32) -> (i32, i32, i32, i32) {
    %c0_i32 = arith.constant 0 : i32
    %c0_i32_0 = arith.constant 0 : i32
    %c0_i32_1 = arith.constant 0 : i32
    return %arg0, %arg1, %c0_i32, %c0_i32_0 : i32, i32, i32, i32
  }
  func.func @transform_1(%arg0: i32, %arg1: i32) -> (i32, i32, i32, i32) {
    %c0_i32 = arith.constant 0 : i32
    %c0_i32_0 = arith.constant 0 : i32
    %c0_i32_1 = arith.constant 0 : i32
    return %arg0, %arg1, %c0_i32, %c0_i32_0 : i32, i32, i32, i32
  }
  func.func @transform_2(%arg0: i32, %arg1: i32) -> (i32, i32, i32) {
    %c0_i32 = arith.constant 0 : i32
    %c0_i32_0 = arith.constant 0 : i32
    %c0_i32_1 = arith.constant 0 : i32
    %c0_i32_2 = arith.constant 0 : i32
    return %c0_i32, %c0_i32_0, %c0_i32_1 : i32, i32, i32
  }
  func.func @transform_3(%arg0: i32, %arg1: i32) -> (i32, i32, i32) {
    %c0_i32 = arith.constant 0 : i32
    %c0_i32_0 = arith.constant 0 : i32
    %c0_i32_1 = arith.constant 0 : i32
    %c0_i32_2 = arith.constant 0 : i32
    return %c0_i32, %c0_i32_0, %c0_i32_1 : i32, i32, i32
  }
  func.func @transform_4(%arg0: i32, %arg1: i32) -> (i32, i32, i32, i32) {
    %c0_i32 = arith.constant 0 : i32
    %c0_i32_0 = arith.constant 0 : i32
    %c0_i32_1 = arith.constant 0 : i32
    return %arg0, %arg1, %c0_i32, %c0_i32_0 : i32, i32, i32, i32
  }
}

</mosaic_0001>

<bundles_post_ra>
// kernel: tpu_custom_call.1
= control target key start
LH: loop header
LB: loop body
LE: loop exit
PB: predicated region body
PF: predicated region fallthrough
CT: control target
= control target key end

     0   :  { %9 = vsyncpa [#allocation3], 0  ;;  %s6699_s0 = inlined_call_operand.vmem [shape: f32[2,4,64,16], index: 0, kind: input, shape index: {}]   ;;  %s6700_s1 = inlined_call_operand.vmem [shape: f32[2,4,64,16], index: 1, kind: input, shape index: {}]   ;;  %s6701_s2 = inlined_call_operand.vmem [shape: f32[8,8,16], index: 2, kind: input, shape index: {}]   ;;  %s6702_s3 = inlined_call_operand.vmem [shape: f32[8,8,16], index: 3, kind: input, shape index: {}]   ;;  %s6703_s4 = inlined_call_operand.hbm [shape: f32[2,4,64,64], index: 4, kind: output, shape index: {}]  }
   0x1   :  { %11 = vsyncpa [#allocation3 + $0x1], 0  ;;  %s4746_s15 = smov 0   ;;  %s4748_s16 = smov 0  }
   0x2   :  { %s4750_s17 = smov 0   ;;  %s4752_s18 = smov 0  }
   0x3   :  { %s4754_s19 = smov 0   ;;  %s4756_s20 = smov 0  }
   0x4   :  { %s4758_s21 = smov 0   ;;  %s4760_s22 = smov 0  }
   0x5 LB: > { %s4352_s23 = sadd.s32 4294967295, %s4709_s22   ;;  %s4353_s24 = sadd.s32 4294967294, %s4709_s22   ;;  %s4709_s22 = sphi %s4760_s22, %s17_s22   ;;  %s4705_s21 = sphi %s4758_s21, %s6928_s21   ;;  %s4701_s20 = sphi %s4756_s20, %s6927_s20   ;;  %s4697_s19 = sphi %s4754_s19, %s6926_s19   ;;  %s4693_s18 = sphi %s4752_s18, %s6925_s18   ;;  %s4689_s17 = sphi %s4750_s17, %s6924_s17   ;;  %s4685_s16 = sphi %s4748_s16, %s6923_s16   ;;  %s4681_s15 = sphi %s4746_s15, %s6922_s15  }
   0x6   : > { %s26_s25 = sadd.s32 1, %s4701_s20  ;;  %s29_s26 = sadd.s32 1, %s4705_s21 }
   0x7   : > { %p27_p0 = scmp.ge.s32.totalorder %s26_s25, 4  ;;  %p146_p1 = scmp.ne.s32.totalorder %s4689_s17, %s4685_s16 }
   0x8   : > { %p147_p2 = scmp.eq.s32.totalorder %s4352_s23, 7  ;;  %p152_p5 = scmp.ne.s32.totalorder %s4685_s16, %s4681_s15 }
   0x9   : > { %s6930_s25 = smov (%p27_p0, %s26_s25), 0  ;;  %s6932_s26 = smov (!%p27_p0, %s29_s26), %s4705_s21 }
   0xa   : > { %s132_s27 = ssub.s32 %s4701_s20, %s6930_s25  ;;  %p4797_p3 = por %p147_p2, %p146_p1 }
   0xb   : > { %p31_p4 = scmp.ge.s32.totalorder %s6932_s26, 2  ;;  %p153_p6 = scmp.eq.s32.totalorder %s4353_s24, 7 }
   0xc   : > { %p4356_p7 = scmp.ge.s32.totalorder %s4709_s22, 1  ;;  %p201_p9 = scmp.lt.s32.totalorder %s4709_s22, 9 }
   0xd   : > { %s6934_s26 = smov (%p31_p4, %s6932_s26), 0  ;;  %p4806_p8 = por %p153_p6, %p152_p5 }
   0xe   : > { %s131_s30 = ssub.s32 %s4705_s21, %s6934_s26  ;;  %s136_s5 = sadd.s32 1, %s4689_s17 }
   0xf   : > { %s133_s6 = sor.u32 %s132_s27, %s131_s30  ;;  %p202_p10 = pnand %p4356_p7, %p201_p9 }
  0x10   : > { %p134_p11 = scmp.eq.s32.totalorder %s133_s6, 0 }
  0x11   : > { %205 = sbr.rel (%p202_p10) target bundleno = 1195 (0x4ab), region = 36 }
  0x12   : > { %s4815_s7 = scalar_select %p134_p11, %s4689_s17, %s136_s5  }
  0x16   : > { %v274_v0 = vld [vmem:[%s6702_s3] sm:$0xff]  ;;  %vm282_vm0 = vcmask 130048   ;;  %p240_p12 = scmp.lt.s32.totalorder %s4697_s19, 1  ;;  %p242_p13 = scmp.lt.s32.totalorder %s4693_s18, 3  ;;  %v275_v1 = vld [vmem:[%s6702_s3 + $0x8] sm:$0xff]  ;;  %v276_v2 = vld [vmem:[%s6702_s3 + $0x10] sm:$0xff]  ;;  %v2269_v18 = vlaneseq }
  0x17   : > { %4364 = vmatpush.xpose.msk.msra.mxu1 %vm282_vm0, %v274_v0  ;;  %4368 = vmatpush.xpose.msk.msra.mxu3 %vm282_vm0, %v276_v2  ;;  %v277_v3 = vld [vmem:[%s6702_s3 + $0x18] sm:$0xff]  ;;  %v278_v4 = vld [vmem:[%s6702_s3 + $0x20] sm:$0xff]  ;;  %v279_v12 = vld [vmem:[%s6702_s3 + $0x28] sm:$0xff]  ;;  %v4711_v40 = vmov 1983009808   ;;  %vm756_vm1 = vcmask 1047556  }
  0x18   : > { %s241_s24 = scalar_select %p240_p12, %s4697_s19, 1  ;;  %v4875_v19 = vshrl.u32 %v2269_v18, 7  ;;  %v761_v41 = vunpack.c.l.s4 %v4711_v40  ;;  %v4712_v49 = vmov 1934713408   ;;  %vm4092_vm2 = vcmask 64512  }
  0x19   : > { %s243_s27 = scalar_select %p242_p13, %s4693_s18, 3  ;;  %v809_v50 = vunpack.c.l.s4 %v4712_v49  ;;  %vm4109_vm3 = vcmask 195584   ;;  %vm4118_vm4 = vcmask 261120   ;;  %vm4127_vm5 = vcmask 326656  }
  0x1a   : > { %s4359_s30 = sshll.u32 %s241_s24, 5  ;;  %v4904_v44 = vunpack.c.0.s8 %v761_v41  ;;  %s4713_s24 = smov 8   ;;  %vm4136_vm6 = vcmask 392192   ;;  %vm4145_vm7 = vcmask 457728   ;;  %vm4219_vm8 = vcmask 523264  }
  0x1b   : > { %4366 = vmatpush.xpose.msk.msrb.mxu1 %vm282_vm0, %v275_v1  ;;  %4370 = vmatpush.xpose.msk.msrb.mxu3 %vm282_vm0, %v277_v3  ;;  %s4358_s5 = sshll.u32 %s243_s27, 3  ;;  %v4910_v0 = vunpack.c.0.s8 %v809_v50  ;;  %s4714_s27 = smov 16  }
  0x1c   : > { %s4837_s6 = sadd.s32 %s4359_s30, %s4358_s5  ;;  %s4715_s30 = smov 24  }
  0x1d   : > { %s4360_s8 = sshll.u32 %s4837_s6, 3  ;;  %s4716_s6 = smov 32  }
  0x1e   : > { %s4845_s11 = scalar_lea.vmem %s6699_s0, %s4360_s8  ;;  %s5960_s10 = scalar_lea.vmem %s6700_s1, %s4360_s8 }
  0x1f   : > { %v258_v5 = vld [vmem:[%s4845_s11] sm:$0xff]  ;;  %v263_v7 = vld [vmem:[%s4845_s11 + $0x28] sm:$0xff]  ;;  %v260_v11 = vld [vmem:[%s4845_s11 + $0x10] sm:$0xff]  ;;  %s4717_s8 = smov 40   ;;  %s4718_s12 = smov 48  }
  0x20   : > { %v262_v6 = vld [vmem:[%s4845_s11 + $0x20] sm:$0xff]  ;;  %4365 = vmatmul.msk.f32.vlgmr.msra.gmra.mxu1 %vm282_vm0, %v258_v5  ;;  %v259_v9 = vld [vmem:[%s4845_s11 + $0x8] sm:$0xff]  ;;  %4369 = vmatmul.msk.f32.vlgmr.msra.gmra.mxu3 %vm282_vm0, %v260_v11  ;;  %v261_v13 = vld [vmem:[%s4845_s11 + $0x18] sm:$0xff]  ;;  %s237_s13 = sand.u32 1, %s4685_s16  }
  0x21   : > { %v4524_v8 = vpack.i.bf16 %v263_v7, %v262_v6  ;;  %v4500_v10 = vpack.i.bf16 %v259_v9, %v258_v5  ;;  %4372 = vmatpush.xpose.msk.msra.mxu1 %vm282_vm0, %v278_v4  ;;  %v4866_v14 = vld [vmem:[%s4845_s11 + $0x30] sm:$0xff]  ;;  %v4869_v15 = vld [vmem:[%s4845_s11 + $0x38] sm:$0xff]  ;;  %v4512_v17 = vpack.i.bf16 %v261_v13, %v260_v11  ;;  %s4357_s14 = sshll.u32 %s237_s13, 6 }
  0x22   : > { %v4536_v16 = vpack.i.bf16 %v4869_v15, %v4866_v14  ;;  %s6596_s23 = scalar_lea.vmem [#allocation2], %s4357_s14 }
  0x23   : > { %4525 = vxpose.xlu1.b32.start.end [1/1] (short) (narrow) %v4524_v8, 16  ;;  %4501 = vxpose.xlu0.b32.start.end [1/1] (short) (narrow) %v4500_v10, 16 }
  0x28   : > { %4367 = vmatmul.msk.f32.vlgmr.msrb.gmra.mxu1 %vm282_vm0, %v259_v9  ;;  %4371 = vmatmul.msk.f32.vlgmr.msrb.gmra.mxu3 %vm282_vm0, %v261_v13 }
  0x29   : > { %4374 = vmatpush.xpose.msk.msrb.mxu1 %vm282_vm0, %v279_v12 }
  0x30   : > { %4373 = vmatmul.msk.f32.vlgmr.msra.gmra.mxu1 %vm282_vm0, %v262_v6 }
  0x33   : > { %4537 = vxpose.xlu1.b32.start.end [1/1] (short) (narrow) %v4536_v16, 16  ;;  %4513 = vxpose.xlu0.b32.start.end [1/1] (short) (narrow) %v4512_v17, 16 }
  0x38   : > { %4375 = vmatmul.msk.f32.vlgmr.msrb.gmra.mxu1 %vm282_vm0, %v263_v7 }
  0x86   : > { %4584 = vset.pattern.permute.xlu1 %v4875_v19 }
  0x9a   : > { %4583 = vset.pattern.permute.xlu0 %v4875_v19 }
  0x9d   : > { %v4879_v20 = vpop.f32.mrf.mxu1 }
  0x9e   : > { %v2275_v21 = vperm.slane %v4879_v20, 1  ;;  %v2289_v22 = vperm.slane %v4879_v20, 3  ;;  %v2268_v23 = vperm.slane %v4879_v20, 0  ;;  %v2296_v24 = vperm.slane %v4879_v20, 4 }
  0x9f   : > { %v2317_v25 = vperm.slane %v4879_v20, 7  ;;  %v2310_v28 = vperm.slane %v4879_v20, 6 }
  0xa0   : > { %2280 = vperm.xlu1 %4584, %v2275_v21  }
  0xa3   : > { %v4892_v31 = vpop.f32.mrf.mxu3 }
  0xa4   : > { %v2380_v32 = vperm.slane %v4892_v31, 0  ;;  %v2401_v36 = vperm.slane %v4892_v31, 3  ;;  %v2394_v45 = vperm.slane %v4892_v31, 2  ;;  %v2422_v46 = vperm.slane %v4892_v31, 6 }
  0xa5   : > { %v4886_v26 = vpop.f32.mrf.mxu1  ;;  %v2415_v48 = vperm.slane %v4892_v31, 5 }
  0xa6   : > { %v2338_v27 = vperm.slane %v4886_v26, 2  ;;  %v2331_v29 = vperm.slane %v4886_v26, 1  ;;  %v2359_v30 = vperm.slane %v4886_v26, 5  ;;  %v2352_v34 = vperm.slane %v4886_v26, 4 }
  0xa7   : > { %v2373_v38 = vperm.slane %v4886_v26, 7 }
  0xa8   : > { %2294 = vperm.xlu1 %4584, %v2289_v22  }
  0xa9   : > { %2273 = vperm.xlu0 %4583, %v2268_v23  }
  0xab   : > { %v4902_v42 = vpop.f32.mrf.mxu3 }
  0xac   : > { %v2443_v47 = vperm.slane %v4902_v42, 1  ;;  %v2464_v7 = vperm.slane %v4902_v42, 4  ;;  %v2436_v8 = vperm.slane %v4902_v42, 0 }
  0xb0   : > { %2301 = vperm.xlu1 %4584, %v2296_v24  }
  0xb1   : > { %2322 = vperm.xlu0 %4583, %v2317_v25  }
  0xb8   : > { %2315 = vperm.xlu1 %4584, %v2310_v28  }
  0xb9   : > { %2343 = vperm.xlu0 %4583, %v2338_v27  }
  0xc0   : > { %2336 = vperm.xlu1 %4584, %v2331_v29  }
  0xc1   : > { %2364 = vperm.xlu0 %4583, %v2359_v30  }
  0xc7   : > { %v4526_v33 = vpop.trf.xlu1  ;;  %v4502_v35 = vpop.trf.xlu0 }
  0xc8   : > { %2357 = vperm.xlu1 %4584, %v2352_v34   ;;  %v4506_v43 = vunpack.i.h.bf16 %v4502_v35  ;;  %v4530_v51 = vunpack.i.h.bf16 %v4526_v33  ;;  %v4527_v52 = vunpack.i.l.bf16 %v4526_v33  ;;  %v4503_v54 = vunpack.i.l.bf16 %v4502_v35 }
  0xc9   : > { %2385 = vperm.xlu0 %4583, %v2380_v32  }
  0xca   : > { %v770_v53 = vrot.slane %v4506_v43, 4  ;;  %v794_v61 = vrot.slane %v4530_v51, 4  ;;  %v782_v1 = vrot.slane %v4527_v52, 4  ;;  %v758_v2 = vrot.slane %v4503_v54, 4 }
  0xcf   : > { %v4897_v37 = vpop.trf.xlu1  ;;  %v4900_v39 = vpop.trf.xlu0 }
  0xd0   : > { %2378 = vperm.xlu1 %4584, %v2373_v38   ;;  %v4535_v9 = vunpack.i.h.bf16 %v4897_v37  ;;  %v4532_v10 = vunpack.i.l.bf16 %v4897_v37  ;;  %v4511_v21 = vunpack.i.h.bf16 %v4900_v39 }
  0xd1   : > { %2406 = vperm.xlu0 %4583, %v2401_v36  }
  0xd7   : > { %v4538_v55 = vpop.trf.xlu1  ;;  %v4514_v58 = vpop.trf.xlu0 }
  0xd8   : > { %v4542_v56 = vunpack.i.h.bf16 %v4538_v55  ;;  %v4539_v57 = vunpack.i.l.bf16 %v4538_v55  ;;  %v4518_v59 = vunpack.i.h.bf16 %v4514_v58  ;;  %v4515_v60 = vunpack.i.l.bf16 %v4514_v58  ;;  %2399 = vperm.xlu1 %4584, %v2394_v45  }
  0xd9   : > { %2427 = vperm.xlu0 %4583, %v2422_v46   ;;  %v906_v45 = vrot.slane %v4535_v9, 4  ;;  %v4508_v46 = vunpack.i.l.bf16 %v4900_v39 }
  0xda   : > { %v792_v62 = vrot.slane %v4542_v56, 4  ;;  %v780_v63 = vrot.slane %v4539_v57, 4  ;;  %v768_v3 = vrot.slane %v4518_v59, 4  ;;  %v755_v4 = vrot.slane %v4515_v60, 4 }
  0xdb   : > { %v771_v12 = vsel %vm756_vm1, %v4518_v59, %v770_v53  ;;  %v795_v22 = vsel %vm756_vm1, %v4542_v56, %v794_v61  ;;  %v759_v23 = vsel %vm756_vm1, %v4515_v60, %v758_v2  ;;  %v783_v34 = vsel %vm756_vm1, %v4539_v57, %v782_v1 }
  0xdc   : > { %v793_v5 = vsel %vm756_vm1, %v792_v62, %v4530_v51  ;;  %v781_v6 = vsel %vm756_vm1, %v780_v63, %v4527_v52  ;;  %v769_v11 = vsel %vm756_vm1, %v768_v3, %v4506_v43  ;;  %v757_v13 = vsel %vm756_vm1, %v755_v4, %v4503_v54 }
  0xdd   : > { %v775_v16 = vperm.slane %v769_v11, %v4904_v44  ;;  %v787_v17 = vperm.slane %v781_v6, %v4904_v44  ;;  %v799_v18 = vperm.slane %v793_v5, %v4904_v44  ;;  %v763_v24 = vperm.slane %v757_v13, %v4904_v44 }
  0xde   : > { %v4934_v32 = vperm.slane %v771_v12, %v4904_v44  ;;  %v4942_v38 = vperm.slane %v795_v22, %v4904_v44  ;;  %v4954_v52 = vperm.slane %v783_v34, %v4904_v44  ;;  %v894_v59 = vrot.slane %v4532_v10, 4 }
  0xdf   : > { %v4928_v25 = vpop.trf.xlu1  ;;  %v804_v27 = vrot.slane %v775_v16, 4  ;;  %v828_v28 = vrot.slane %v799_v18, 4  ;;  %v4931_v30 = vpop.trf.xlu0  ;;  %v806_v57 = vrot.slane %v763_v24, 4  ;;  %v830_v2 = vrot.slane %v787_v17, 4 }
  0xe0   : > { %v4547_v29 = vunpack.i.h.bf16 %v4928_v25  ;;  %2420 = vperm.xlu1 %4584, %v2415_v48   ;;  %v4544_v33 = vunpack.i.l.bf16 %v4928_v25  ;;  %v4523_v37 = vunpack.i.h.bf16 %v4931_v30  ;;  %v816_v51 = vrot.slane %v4934_v32, 4 }
  0xe1   : > { %2448 = vperm.xlu0 %4583, %v2443_v47   ;;  %v805_v35 = vsel %vm756_vm1, %v804_v27, %v763_v24  ;;  %v829_v36 = vsel %vm756_vm1, %v828_v28, %v787_v17  ;;  %v4950_v47 = vperm.slane %v759_v23, %v4904_v44  ;;  %v4520_v55 = vunpack.i.l.bf16 %v4931_v30 }
  0xe2   : > { %v811_v40 = vperm.slane %v805_v35, %v4910_v0  ;;  %v835_v41 = vperm.slane %v829_v36, %v4910_v0  ;;  %v892_v43 = vrot.slane %v4544_v33, 4  ;;  %v904_v48 = vrot.slane %v4547_v29, 4 }
  0xe3   : > { %v880_v54 = vrot.slane %v4523_v37, 4  ;;  %v840_v58 = vrot.slane %v4942_v38, 4  ;;  %v868_v62 = vrot.slane %v4520_v55, 4  ;;  %v807_v1 = vsel %vm756_vm1, %v775_v16, %v806_v57 }
  0xe4   : > { %v852_v49 = vrot.slane %v835_v41, 4  ;;  %v854_v50 = vrot.slane %v811_v40, 4  ;;  %v893_v53 = vsel %vm756_vm1, %v892_v43, %v4532_v10  ;;  %v905_v61 = vsel %vm756_vm1, %v904_v48, %v4535_v9 }
  0xe5   : > { %v4963_v63 = vperm.slane %v893_v53, %v4904_v44  ;;  %v817_v3 = vsel %vm756_vm1, %v816_v51, %v4950_v47  ;;  %v882_v4 = vrot.slane %v4511_v21, 4  ;;  %v869_v5 = vsel %vm756_vm1, %v868_v62, %v4508_v46 }
  0xe6   : > { %v853_v56 = vsel %vm756_vm1, %v852_v49, %v811_v40  ;;  %v855_v39 = vsel %vm756_vm1, %v835_v41, %v854_v50  ;;  %v881_v6 = vsel %vm756_vm1, %v880_v54, %v4511_v21  ;;  %v815_v9 = vperm.slane %v807_v1, %v4910_v0  ;;  %v5008_v50 = vpop.f32.mrf.mxu1 }
  0xe7   : > { %v4548_v60 = vpack.i.bf16 %v855_v39, %v853_v56  ;;  %v4973_v10 = vperm.slane %v869_v5, %v4904_v44  ;;  %v831_v11 = vsel %vm756_vm1, %v799_v18, %v830_v2  ;;  %v841_v12 = vsel %vm756_vm1, %v840_v58, %v4954_v52 }
  0xe8   : > { %2441 = vperm.xlu1 %4584, %v2436_v8   ;;  %v907_v8 = vsel %vm756_vm1, %v4547_v29, %v906_v45  ;;  %v839_v13 = vperm.slane %v831_v11, %v4910_v0  ;;  %v858_v16 = vrot.slane %v815_v9, 4  ;;  %v847_v17 = vperm.slane %v841_v12, %v4910_v0 }
  0xe9   : > { %4549 = vxpose.xlu2.b32.start.end [1/1] (short) (narrow) %v4548_v60, 8  ;;  %2469 = vperm.xlu0 %4583, %v2464_v7   ;;  %v823_v7 = vperm.slane %v817_v3, %v4910_v0  ;;  %v4982_v21 = vperm.slane %v881_v6, %v4904_v44  ;;  %v4985_v22 = vperm.slane %v905_v61, %v4904_v44  ;;  %v918_v23 = vrot.slane %v4973_v10, 4 }
  0xea   : > { %v942_v18 = vrot.slane %v4963_v63, 4  ;;  %v870_v24 = vrot.slane %v4508_v46, 4  ;;  %v883_v27 = vsel %vm756_vm1, %v4523_v37, %v882_v4  ;;  %v856_v28 = vrot.slane %v839_v13, 4 }
  0xeb   : > { %v859_v29 = vsel %vm756_vm1, %v839_v13, %v858_v16  ;;  %v2485_v30 = vperm.slane %v4902_v42, 7  ;;  %v2457_v34 = vperm.slane %v4902_v42, 3  ;;  %v4994_v35 = vperm.slane %v907_v8, %v4904_v44 }
  0xec   : > { %v857_v36 = vsel %vm756_vm1, %v856_v28, %v815_v9  ;;  %v860_v40 = vrot.slane %v847_v17, 4  ;;  %v862_v41 = vrot.slane %v823_v7, 4  ;;  %v4998_v43 = vperm.slane %v883_v27, %v4904_v44 }
  0xed   : > { %v4555_v45 = vpack.i.bf16 %v859_v29, %v857_v36  ;;  %v919_v37 = vsel %vm756_vm1, %v4982_v21, %v918_v23  ;;  %v943_v46 = vsel %vm756_vm1, %v4985_v22, %v942_v18  ;;  %v895_v48 = vsel %vm756_vm1, %v4544_v33, %v894_v59 }
  0xee   : > { %v871_v49 = vsel %vm756_vm1, %v4520_v55, %v870_v24  ;;  %v861_v51 = vsel %vm756_vm1, %v860_v40, %v823_v7  ;;  %v863_v53 = vsel %vm756_vm1, %v847_v17, %v862_v41  ;;  %v927_v54 = vperm.slane %v919_v37, %v4910_v0  ;;  %v5034_v13 = vpop.f32.mrf.mxu1 }
  0xef   : > { %v951_v56 = vperm.slane %v943_v46, %v4910_v0  ;;  %v5015_v39 = vperm.slane %v895_v48, %v4904_v44  ;;  %v5018_v25 = vperm.slane %v871_v49, %v4904_v44  ;;  %v928_v33 = vrot.slane %v4998_v43, 4 }
  0xf0   : > { %2462 = vperm.xlu1 %4584, %v2457_v34   ;;  %v952_v55 = vrot.slane %v4994_v35, 4  ;;  %v2506_v57 = vperm.slane %v5008_v50, 2  ;;  %v4562_v58 = vpack.i.bf16 %v863_v53, %v861_v51  ;;  %v2478_v59 = vperm.slane %v4902_v42, 6 }
  0xf1   : > { %2490 = vperm.xlu0 %4583, %v2485_v30   ;;  %4556 = vxpose.xlu2.b32.start.end [1/1] (short) (narrow) %v4555_v45, 8  ;;  %v968_v60 = vrot.slane %v951_v56, 4  ;;  %v970_v61 = vrot.slane %v927_v54, 4  ;;  %v929_v62 = vsel %vm756_vm1, %v928_v33, %v5018_v25  ;;  %v2499_v6 = vperm.slane %v5008_v50, 1 }
  0xf2   : > { %v953_v1 = vsel %vm756_vm1, %v952_v55, %v5015_v39  ;;  %v935_v4 = vperm.slane %v929_v62, %v4910_v0  ;;  %v2527_v9 = vperm.slane %v5008_v50, 5  ;;  %v842_v17 = vrot.slane %v4954_v52, 4 }
  0xf3   : > { %v969_v2 = vsel %vm756_vm1, %v968_v60, %v927_v54  ;;  %v971_v3 = vsel %vm756_vm1, %v951_v56, %v970_v61  ;;  %v959_v5 = vperm.slane %v953_v1, %v4910_v0  ;;  %v818_v23 = vrot.slane %v4950_v47, 4 }
  0xf4   : > { %v4569_v8 = vpack.i.bf16 %v971_v3, %v969_v2  ;;  %v974_v12 = vrot.slane %v935_v4, 4  ;;  %v2548_v18 = vperm.slane %v5034_v13, 0  ;;  %v2520_v27 = vperm.slane %v5008_v50, 4 }
  0xf5   : > { %v972_v11 = vrot.slane %v959_v5, 4  ;;  %v819_v28 = vsel %vm756_vm1, %v4934_v32, %v818_v23  ;;  %v843_v29 = vsel %vm756_vm1, %v4942_v38, %v842_v17  ;;  %v916_v52 = vrot.slane %v4982_v21, 4 }
  0xf6   : > { %v975_v7 = vsel %vm756_vm1, %v959_v5, %v974_v12  ;;  %v827_v30 = vperm.slane %v819_v28, %v4910_v0  ;;  %v851_v34 = vperm.slane %v843_v29, %v4910_v0  ;;  %v940_v47 = vrot.slane %v4985_v22, 4 }
  0xf7   : > { %v973_v16 = vsel %vm756_vm1, %v972_v11, %v935_v4  ;;  %v2569_v41 = vperm.slane %v5034_v13, 3  ;;  %v2541_v38 = vperm.slane %v5008_v50, 7  ;;  %v917_v46 = vsel %vm756_vm1, %v916_v52, %v4973_v10 }
  0xf8   : > { %2483 = vperm.xlu1 %4584, %v2478_v59   ;;  %v4576_v24 = vpack.i.bf16 %v975_v7, %v973_v16  ;;  %v864_v36 = vrot.slane %v851_v34, 4  ;;  %v866_v40 = vrot.slane %v827_v30, 4  ;;  %v941_v21 = vsel %vm756_vm1, %v940_v47, %v4963_v63 }
  0xf9   : > { %2511 = vperm.xlu0 %4583, %v2506_v57   ;;  %4563 = vxpose.xlu2.b32.start.end [1/1] (short) (narrow) %v4562_v58, 8  ;;  %v923_v22 = vperm.slane %v917_v46, %v4910_v0  ;;  %v947_v48 = vperm.slane %v941_v21, %v4910_v0  ;;  %v2562_v56 = vperm.slane %v5034_v13, 2  ;;  %v2590_v10 = vperm.slane %v5034_v13, 6 }
  0xfa   : > { %v865_v45 = vsel %vm756_vm1, %v864_v36, %v827_v30  ;;  %v867_v32 = vsel %vm756_vm1, %v851_v34, %v866_v40  ;;  %v2583_v63 = vperm.slane %v5034_v13, 5  ;;  %v954_v55 = vrot.slane %v5015_v39, 4 }
  0xfb   : > { %v4593_v37 = vpack.i.bf16 %v867_v32, %v865_v45  ;;  %v964_v49 = vrot.slane %v947_v48, 4  ;;  %v966_v51 = vrot.slane %v923_v22, 4  ;;  %v930_v57 = vrot.slane %v5018_v25, 4 }
  0xfc   : > { %v955_v59 = vsel %vm756_vm1, %v4994_v35, %v954_v55  ;;  %v2282_v11 = vperm.slane %v4879_v20, 2  ;;  %v2303_v7 = vperm.slane %v4879_v20, 5  ;;  %v2324_v23 = vperm.slane %v4886_v26, 0 }
  0xfd   : > { %v965_v53 = vsel %vm756_vm1, %v964_v49, %v923_v22  ;;  %v967_v54 = vsel %vm756_vm1, %v947_v48, %v966_v51  ;;  %v931_v58 = vsel %vm756_vm1, %v4998_v43, %v930_v57  ;;  %v963_v61 = vperm.slane %v955_v59, %v4910_v0 }
  0xfe   : > { %v4586_v33 = vpack.i.bf16 %v967_v54, %v965_v53  ;;  %v939_v60 = vperm.slane %v931_v58, %v4910_v0  ;;  %v2345_v29 = vperm.slane %v4886_v26, 3  ;;  %v2366_v21 = vperm.slane %v4886_v26, 6 }
  0xff   : > { %v976_v62 = vrot.slane %v963_v61, 4  ;;  %v2387_v49 = vperm.slane %v4892_v31, 1  ;;  %v2450_v57 = vperm.slane %v4902_v42, 2 }
 0x100   : > { %2504 = vperm.xlu1 %4584, %v2499_v6   ;;  %v978_v1 = vrot.slane %v939_v60, 4 }
 0x101   : > { %2532 = vperm.xlu0 %4583, %v2527_v9   ;;  %4570 = vxpose.xlu2.b32.start.end [1/1] (short) (narrow) %v4569_v8, 8  ;;  %v977_v2 = vsel %vm756_vm1, %v976_v62, %v939_v60  ;;  %v2471_v60 = vperm.slane %v4902_v42, 5 }
 0x102   : > { %v979_v3 = vsel %vm756_vm1, %v963_v61, %v978_v1 }
 0x103   : > { %v4600_v39 = vpack.i.bf16 %v979_v3, %v977_v2 }
 0x108   : > { %2525 = vperm.xlu1 %4584, %v2520_v27  }
 0x109   : > { %2553 = vperm.xlu0 %4583, %v2548_v18   ;;  %4577 = vxpose.xlu2.b32.start.end [1/1] (short) (narrow) %v4576_v24, 8 }
 0x110   : > { %2546 = vperm.xlu1 %4584, %v2541_v38  }
 0x111   : > { %2574 = vperm.xlu0 %4583, %v2569_v41  }
 0x112   : > { %v5077_v4 = vpop.permute.xlu1 %2280 }
 0x118   : > { %2567 = vperm.xlu1 %4584, %v2562_v56   ;;  %v2408_v56 = vperm.slane %v4892_v31, 4 }
 0x119   : > { %2595 = vperm.xlu0 %4583, %v2590_v10   ;;  %v2429_v10 = vperm.slane %v4892_v31, 7 }
 0x11a   : > { %v5081_v35 = vpop.permute.xlu1 %2294 }
 0x11b   : > { %v5075_v25 = vpop.permute.xlu0 %2273 }
 0x120   : > { %2588 = vperm.xlu1 %4584, %v2583_v63  }
 0x122   : > { %v5085_v6 = vpop.permute.xlu1 %2301 }
 0x123   : > { %v5079_v43 = vpop.permute.xlu0 %2322 }
 0x12a   : > { %v5090_v8 = vpop.permute.xlu1 %2315 }
 0x12b   : > { %v5083_v5 = vpop.permute.xlu0 %2343 }
 0x132   : > { %v5095_v16 = vpop.permute.xlu1 %2336 }
 0x133   : > { %v5087_v9 = vpop.permute.xlu0 %2364  ;;  %6766 = vst [vmem:[#allocation6_spill] sm:$0xff] %v5095_v16 }
 0x134   : > { %6765 = vst [vmem:[#allocation5_spill] sm:$0xff] %v5087_v9 }
 0x13a   : > { %v5101_v18 = vpop.permute.xlu1 %2357 }
 0x13b   : > { %4594 = vxpose.xlu0.b32.start.end [1/1] (short) (narrow) %v4593_v37, 8  ;;  %v5093_v12 = vpop.permute.xlu0 %2385  ;;  %6767 = vst [vmem:[#allocation7_spill] sm:$0xff] %v5101_v18 }
 0x142   : > { %v5106_v20 = vpop.permute.xlu1 %2378 }
 0x143   : > { %4601 = vxpose.xlu0.b32.start.end [1/1] (short) (narrow) %v4600_v39, 8  ;;  %v5098_v17 = vpop.permute.xlu0 %2406  ;;  %6768 = vst [vmem:[#allocation8_spill] sm:$0xff] %v5106_v20  ;;  %v2492_v39 = vperm.slane %v5008_v50, 0 }
 0x14a   : > { %v5117_v48 = vpop.permute.xlu1 %2399 }
 0x14b   : > { %v5103_v24 = vpop.permute.xlu0 %2427 }
 0x152   : > { %v5124_v54 = vpop.permute.xlu1 %2420 }
 0x153   : > { %v5110_v38 = vpop.permute.xlu0 %2448 }
 0x155   : > { %4587 = vxpose.xlu1.b32.start.end [1/1] (short) (narrow) %v4586_v33, 8 }
 0x15a   : > { %v5132_v63 = vpop.permute.xlu1 %2441 }
 0x15b   : > { %v5120_v51 = vpop.permute.xlu0 %2469 }
 0x162   : > { %v5137_v58 = vpop.permute.xlu1 %2462 }
 0x163   : > { %v5129_v26 = vpop.permute.xlu0 %2490 }
 0x16a   : > { %v5143_v62 = vpop.permute.xlu1 %2483 }
 0x16b   : > { %4585 = vset.pattern.permute.xlu2 %v4875_v19  ;;  %v5134_v55 = vpop.permute.xlu0 %2511 }
 0x16c   : > { %6769 = vst [vmem:[#allocation9_spill] sm:$0xff] %v5134_v55 }
 0x173   : > { %2287 = vperm.xlu2 %4585, %v2282_v11   ;;  %v5139_v59 = vpop.permute.xlu0 %2532 }
 0x174   : > { %6770 = vst [vmem:[#allocation10_spill] sm:$0xff] %v5139_v59 }
 0x17b   : > { %2308 = vperm.xlu2 %4585, %v2303_v7   ;;  %v5149_v7 = vpop.permute.xlu0 %2553 }
 0x182   : > { %v4550_v19 = vpop.trf.xlu2 }
 0x183   : > { %2329 = vperm.xlu2 %4585, %v2324_v23   ;;  %v4554_v27 = vunpack.i.h.bf16 %v4550_v19  ;;  %v4551_v28 = vunpack.i.l.bf16 %v4550_v19 }
 0x185   : > { %v1506_v30 = vrot.slane %v4554_v27, 4  ;;  %v1494_v34 = vrot.slane %v4551_v28, 4 }
 0x18a   : > { %v4557_v52 = vpop.trf.xlu2 }
 0x18b   : > { %2350 = vperm.xlu2 %4585, %v2345_v29   ;;  %v4561_v47 = vunpack.i.h.bf16 %v4557_v52  ;;  %v4558_v36 = vunpack.i.l.bf16 %v4557_v52  ;;  %v5158_v52 = vpop.permute.xlu0 %2574 }
 0x18d   : > { %v1504_v40 = vrot.slane %v4561_v47, 4  ;;  %v1492_v41 = vrot.slane %v4558_v36, 4  ;;  %v1495_v45 = vsel %vm756_vm1, %v4558_v36, %v1494_v34  ;;  %v1507_v32 = vsel %vm756_vm1, %v4561_v47, %v1506_v30  ;;  %v5155_v30 = vpop.permute.xlu1 %2504 }
 0x18e   : > { %v1503_v1 = vperm.slane %v1495_v45, %v4904_v44  ;;  %v1515_v11 = vperm.slane %v1507_v32, %v4904_v44  ;;  %6771 = vst [vmem:[#allocation11_spill] sm:$0xff] %v5155_v30  ;;  %v2513_v34 = vperm.slane %v5008_v50, 3  ;;  %v2534_v47 = vperm.slane %v5008_v50, 6 }
 0x18f   : > { %v1493_v37 = vsel %vm756_vm1, %v1492_v41, %v4551_v28  ;;  %v1505_v46 = vsel %vm756_vm1, %v1504_v40, %v4554_v27  ;;  %v280_v40 = vld [vmem:[%s6702_s3 + $0x30] sm:$0xff] }
 0x190   : > { %v1511_v61 = vperm.slane %v1505_v46, %v4904_v44  ;;  %v1499_v31 = vperm.slane %v1493_v37, %v4904_v44  ;;  %v1554_v19 = vrot.slane %v1503_v1, 4  ;;  %v1552_v28 = vrot.slane %v1515_v11, 4  ;;  %4376 = vmatpush.xpose.msk.msra.mxu3 %vm282_vm0, %v280_v40 }
 0x191   : > { %v2555_v37 = vperm.slane %v5034_v13, 1 }
 0x192   : > { %v5115_v22 = vpop.trf.xlu2  ;;  %v1540_v2 = vrot.slane %v1511_v61, 4  ;;  %v1542_v3 = vrot.slane %v1499_v31, 4  ;;  %v1555_v27 = vsel %vm756_vm1, %v1515_v11, %v1554_v19  ;;  %v1553_v29 = vsel %vm756_vm1, %v1552_v28, %v1503_v1 }
 0x193   : > { %2371 = vperm.xlu2 %4585, %v2366_v21   ;;  %v5166_v41 = vpop.permute.xlu0 %2595  ;;  %v4568_v45 = vunpack.i.h.bf16 %v5115_v22  ;;  %v4565_v32 = vunpack.i.l.bf16 %v5115_v22  ;;  %4377 = vmatmul.msk.f32.vlgmr.msra.gmra.mxu3 %vm282_vm0, %v4866_v14  ;;  %v2576_v22 = vperm.slane %v5034_v13, 4 }
 0x194   : > { %v1541_v23 = vsel %vm756_vm1, %v1540_v2, %v1499_v31  ;;  %v1543_v42 = vsel %vm756_vm1, %v1511_v61, %v1542_v3 }
 0x195   : > { %v5161_v36 = vpop.permute.xlu1 %2525  ;;  %v1530_v46 = vrot.slane %v4568_v45, 4  ;;  %v1518_v21 = vrot.slane %v4565_v32, 4 }
 0x196   : > { %6772 = vst [vmem:[#allocation12_spill] sm:$0xff] %v5161_v36 }
 0x19a   : > { %v5122_v53 = vpop.trf.xlu2 }
 0x19b   : > { %2392 = vperm.xlu2 %4585, %v2387_v49   ;;  %v281_v49 = vld [vmem:[%s6702_s3 + $0x38] sm:$0xff] }
 0x19c   : > { %4378 = vmatpush.xpose.msk.msrb.mxu3 %vm282_vm0, %v281_v49 }
 0x19d   : > { %v5174_v50 = vpop.permute.xlu1 %2546 }
 0x19e   : > { %6773 = vst [vmem:[#allocation13_spill] sm:$0xff] %v5174_v50 }
 0x19f   : > { %4379 = vmatmul.msk.f32.vlgmr.msrb.gmra.mxu3 %vm282_vm0, %v4869_v15  ;;  %v1547_v15 = vperm.slane %v1541_v23, %v4910_v0 }
 0x1a2   : > { %v5127_v33 = vpop.trf.xlu2 }
 0x1a3   : > { %2413 = vperm.xlu2 %4585, %v2408_v56   ;;  %v4579_v40 = vunpack.i.l.bf16 %v5127_v33 }
 0x1ab   : > { %2434 = vperm.xlu2 %4585, %v2429_v10  }
 0x1b3   : > { %2455 = vperm.xlu2 %4585, %v2450_v57  }
 0x1bb   : > { %2476 = vperm.xlu2 %4585, %v2471_v60  }
 0x1c3   : > { %2497 = vperm.xlu2 %4585, %v2492_v39  }
 0x1cb   : > { %2518 = vperm.xlu2 %4585, %v2513_v34  }
 0x1d3   : > { %2539 = vperm.xlu2 %4585, %v2534_v47   ;;  %v4582_v47 = vunpack.i.h.bf16 %v5127_v33 }
 0x1db   : > { %2560 = vperm.xlu2 %4585, %v2555_v37   ;;  %v1551_v37 = vperm.slane %v1543_v42, %v4910_v0  ;;  %v2597_v42 = vperm.slane %v5034_v13, 7 }
 0x1df   : > { %v4595_v56 = vpop.trf.xlu0 }
 0x1e0   : > { %v4599_v10 = vunpack.i.h.bf16 %v4595_v56  ;;  %v4596_v57 = vunpack.i.l.bf16 %v4595_v56 }
 0x1e2   : > { %v1528_v60 = vrot.slane %v4599_v10, 4  ;;  %v1531_v61 = vsel %vm756_vm1, %v4599_v10, %v1530_v46  ;;  %v1516_v14 = vrot.slane %v4596_v57, 4  ;;  %v1519_v31 = vsel %vm756_vm1, %v4596_v57, %v1518_v21  ;;  %v5195_v46 = vpop.permute.xlu1 %2567 }
 0x1e3   : > { %v1539_v1 = vperm.slane %v1531_v61, %v4904_v44  ;;  %v1527_v2 = vperm.slane %v1519_v31, %v4904_v44  ;;  %2581 = vperm.xlu2 %4585, %v2576_v22   ;;  %v1563_v31 = vperm.slane %v1555_v27, %v4910_v0 }
 0x1e4   : > { %v1529_v3 = vsel %vm756_vm1, %v1528_v60, %v4568_v45  ;;  %v1517_v39 = vsel %vm756_vm1, %v1516_v14, %v4565_v32 }
 0x1e5   : > { %v1535_v11 = vperm.slane %v1529_v3, %v4904_v44  ;;  %v1576_v19 = vrot.slane %v1539_v1, 4  ;;  %v1523_v28 = vperm.slane %v1517_v39, %v4904_v44  ;;  %v1578_v34 = vrot.slane %v1527_v2, 4 }
 0x1e6   : > { %v1642_v3 = vrot.slane %v4582_v47, 4  ;;  %v1559_v39 = vperm.slane %v1553_v29, %v4910_v0 }
 0x1e7   : > { %v4602_v45 = vpop.trf.xlu0  ;;  %v1564_v21 = vrot.slane %v1535_v11, 4  ;;  %v1566_v32 = vrot.slane %v1523_v28, 4  ;;  %v1579_v49 = vsel %vm756_vm1, %v1539_v1, %v1578_v34  ;;  %v1577_v56 = vsel %vm756_vm1, %v1576_v19, %v1527_v2 }
 0x1e8   : > { %v4606_v10 = vunpack.i.h.bf16 %v4602_v45  ;;  %v4603_v57 = vunpack.i.l.bf16 %v4602_v45  ;;  %v1587_v33 = vperm.slane %v1579_v49, %v4910_v0  ;;  %v1583_v23 = vperm.slane %v1577_v56, %v4910_v0 }
 0x1e9   : > { %v1565_v22 = vsel %vm756_vm1, %v1564_v21, %v1523_v28  ;;  %v1567_v60 = vsel %vm756_vm1, %v1535_v11, %v1566_v32  ;;  %v1630_v19 = vrot.slane %v4579_v40, 4  ;;  %v1590_v11 = vrot.slane %v1547_v15, 4 }
 0x1ea   : > { %v1640_v61 = vrot.slane %v4606_v10, 4  ;;  %v1628_v14 = vrot.slane %v4603_v57, 4  ;;  %v1571_v1 = vperm.slane %v1565_v22, %v4910_v0  ;;  %v1575_v2 = vperm.slane %v1567_v60, %v4910_v0 }
 0x1eb   : > { %2602 = vperm.xlu2 %4585, %v2597_v42   ;;  %v1594_v28 = vrot.slane %v1551_v37, 4  ;;  %v1600_v34 = vrot.slane %v1587_v33, 4  ;;  %v1596_v32 = vrot.slane %v1583_v23, 4  ;;  %v1602_v22 = vrot.slane %v1563_v31, 4 }
 0x1ec   : > { %v1641_v45 = vsel %vm756_vm1, %v1640_v61, %v4582_v47  ;;  %v1629_v13 = vsel %vm756_vm1, %v1628_v14, %v4579_v40  ;;  %v1588_v21 = vrot.slane %v1571_v1, 4  ;;  %v1592_v49 = vrot.slane %v1575_v2, 4  ;;  %v5227_v14 = vpop.permute.xlu1 %2588 }
 0x1ed   : > { %v5211_v27 = vsel %vm756_vm1, %v1571_v1, %v1590_v11  ;;  %v5214_v56 = vsel %vm756_vm1, %v1575_v2, %v1594_v28  ;;  %v1598_v60 = vrot.slane %v1559_v39, 4  ;;  %v1647_v42 = vperm.slane %v1641_v45, %v4904_v44 }
 0x1ee   : > { %v5217_v29 = vsel %vm756_vm1, %v1588_v21, %v1547_v15  ;;  %v1635_v47 = vperm.slane %v1629_v13, %v4904_v44  ;;  %v5222_v40 = vsel %vm756_vm1, %v1592_v49, %v1551_v37  ;;  %v5225_v61 = vsel %vm756_vm1, %v1600_v34, %v1563_v31 }
 0x1ef   : > { %v5230_v1 = vsel %vm756_vm1, %v1596_v32, %v1559_v39  ;;  %v1643_v2 = vsel %vm756_vm1, %v4606_v10, %v1642_v3  ;;  %v1631_v15 = vsel %vm756_vm1, %v4603_v57, %v1630_v19  ;;  %v5235_v11 = vsel %vm756_vm1, %v1587_v33, %v1602_v22 }
 0x1f0   : > { %v5238_v28 = vsel %vm756_vm1, %v1583_v23, %v1598_v60  ;;  %v1676_v37 = vrot.slane %v1647_v42, 4  ;;  %v1678_v45 = vrot.slane %v1635_v47, 4  ;;  %v4575_v31 = vunpack.i.h.bf16 %v5122_v53 }
 0x1f1   : > { %v4572_v34 = vunpack.i.l.bf16 %v5122_v53  ;;  %v1651_v13 = vperm.slane %v1643_v2, %v4904_v44  ;;  %v1639_v39 = vperm.slane %v1631_v15, %v4904_v44 }
 0x1f2   : > { %v1677_v10 = vsel %vm756_vm1, %v1676_v37, %v1635_v47  ;;  %v1679_v57 = vsel %vm756_vm1, %v1647_v42, %v1678_v45  ;;  %v1616_v3 = vrot.slane %v4575_v31, 4 }
 0x1f3   : > { %v1604_v33 = vrot.slane %v4572_v34, 4  ;;  %v1688_v19 = vrot.slane %v1651_v13, 4  ;;  %v1690_v23 = vrot.slane %v1639_v39, 4  ;;  %v1683_v22 = vperm.slane %v1677_v10, %v4910_v0 }
 0x1f4   : > { %v1687_v60 = vperm.slane %v1679_v57, %v4910_v0 }
 0x1f5   : > { %v1691_v37 = vsel %vm756_vm1, %v1651_v13, %v1690_v23  ;;  %v1689_v45 = vsel %vm756_vm1, %v1688_v19, %v1639_v39 }
 0x1f9   : > { %v4588_v21 = vpop.trf.xlu1 }
 0x1fa   : > { %v4592_v32 = vunpack.i.h.bf16 %v4588_v21  ;;  %v4589_v49 = vunpack.i.l.bf16 %v4588_v21 }
 0x1fc   : > { %v1617_v53 = vsel %vm756_vm1, %v1616_v3, %v4592_v32  ;;  %v1618_v2 = vrot.slane %v4592_v32, 4  ;;  %v1605_v15 = vsel %vm756_vm1, %v1604_v33, %v4589_v49  ;;  %v1606_v50 = vrot.slane %v4589_v49, 4 }
 0x1fd   : > { %v1623_v47 = vperm.slane %v1617_v53, %v4904_v44  ;;  %v1611_v42 = vperm.slane %v1605_v15, %v4904_v44  ;;  %v1700_v33 = vrot.slane %v1683_v22, 4  ;;  %v1704_v49 = vrot.slane %v1687_v60, 4 }
 0x1fe   : > { %v1607_v21 = vsel %vm756_vm1, %v4572_v34, %v1606_v50  ;;  %v1619_v10 = vsel %vm756_vm1, %v4575_v31, %v1618_v2  ;;  %v1699_v53 = vperm.slane %v1691_v37, %v4910_v0  ;;  %v1695_v15 = vperm.slane %v1689_v45, %v4910_v0 }
 0x1ff   : > { %v1652_v59 = vrot.slane %v1623_v47, 4  ;;  %v1654_v57 = vrot.slane %v1611_v42, 4  ;;  %v1615_v3 = vperm.slane %v1607_v21, %v4904_v44  ;;  %v1627_v32 = vperm.slane %v1619_v10, %v4904_v44 }
 0x201   : > { %v1653_v13 = vsel %vm756_vm1, %v1652_v59, %v1611_v42  ;;  %v1655_v39 = vsel %vm756_vm1, %v1623_v47, %v1654_v57  ;;  %v1664_v19 = vrot.slane %v1627_v32, 4  ;;  %v1666_v50 = vrot.slane %v1615_v3, 4  ;;  %v491_v59 = vld [vmem:[%s6701_s2] sm:$0xff] }
 0x202   : > { %v1659_v31 = vperm.slane %v1653_v13, %v4910_v0  ;;  %v1663_v34 = vperm.slane %v1655_v39, %v4910_v0  ;;  %v1712_v42 = vrot.slane %v1699_v53, 4 }
 0x203   : > { %v1667_v23 = vsel %vm756_vm1, %v1627_v32, %v1666_v50  ;;  %v1665_v2 = vsel %vm756_vm1, %v1664_v19, %v1615_v3  ;;  %v1708_v32 = vrot.slane %v1695_v15, 4  ;;  %v493_v19 = vld [vmem:[%s6701_s2 + $0x10] sm:$0xff] }
 0x204   : > { %v1701_v21 = vsel %vm756_vm1, %v1700_v33, %v1659_v31  ;;  %v1705_v37 = vsel %vm756_vm1, %v1704_v49, %v1663_v34  ;;  %v1706_v10 = vrot.slane %v1663_v34, 4  ;;  %v1702_v45 = vrot.slane %v1659_v31, 4 }
 0x205   : > { %1733 = vmatpush.msra.mxu3 %v1701_v21  ;;  %1779 = vmatpush.msra.mxu2 %v1705_v37  ;;  %v1675_v47 = vperm.slane %v1667_v23, %v4910_v0  ;;  %v1671_v57 = vperm.slane %v1665_v2, %v4910_v0 }
 0x206   : > { %v1703_v3 = vsel %vm756_vm1, %v1683_v22, %v1702_v45  ;;  %v1707_v33 = vsel %vm756_vm1, %v1687_v60, %v1706_v10  ;;  %v492_v22 = vld [vmem:[%s6701_s2 + $0x8] sm:$0xff] }
 0x207   : > { %1734 = vmatpush.msra.mxu3 %v5217_v29  ;;  %1756 = vmatpush.msra.mxu1 %v1703_v3  ;;  %v1713_v49 = vsel %vm756_vm1, %v1712_v42, %v1675_v47  ;;  %v1714_v13 = vrot.slane %v1675_v47, 4  ;;  %v1709_v39 = vsel %vm756_vm1, %v1708_v32, %v1671_v57  ;;  %v1710_v50 = vrot.slane %v1671_v57, 4 }
 0x208   : > { %1780 = vmatpush.msra.mxu2 %v5222_v40  ;;  %4380 = vmatmul.msk.f32.vlgmr.msra.gmra.mxu3 %vm282_vm0, %v491_v59  ;;  %v494_v40 = vld [vmem:[%s6701_s2 + $0x18] sm:$0xff] }
 0x209   : > { %1802 = vmatpush.msrb.mxu3 %v1707_v33  ;;  %v1715_v29 = vsel %vm756_vm1, %v1699_v53, %v1714_v13  ;;  %v1711_v60 = vsel %vm756_vm1, %v1695_v15, %v1710_v50  ;;  %1757 = vmatpush.msra.mxu1 %v5211_v27  ;;  %v497_v27 = vld [vmem:[%s6701_s2 + $0x30] sm:$0xff] }
 0x20a   : > { %1871 = vmatpush.msrb.mxu2 %v1713_v49  ;;  %4381 = vmatmul.msk.f32.vlgmr.msra.gmra.mxu1 %vm282_vm0, %v492_v22 }
 0x20b   : > { %4382 = vmatmul.msk.f32.vlgmr.msra.gmra.mxu2 %vm282_vm0, %v493_v19  ;;  %1803 = vmatpush.msrb.mxu3 %v5214_v56  ;;  %v495_v56 = vld [vmem:[%s6701_s2 + $0x20] sm:$0xff] }
 0x20c   : > { %1825 = vmatpush.msrb.mxu1 %v1709_v39  ;;  %1872 = vmatpush.msrb.mxu2 %v5225_v61  ;;  %v498_v61 = vld [vmem:[%s6701_s2 + $0x38] sm:$0xff] }
 0x20d   : > { %1894 = vmatpush.msra.mxu3 %v1715_v29 }
 0x20e   : > { %1826 = vmatpush.msrb.mxu1 %v5230_v1  ;;  %v496_v1 = vld [vmem:[%s6701_s2 + $0x28] sm:$0xff] }
 0x20f   : > { %1895 = vmatpush.msra.mxu3 %v5235_v11 }
 0x210   : > { %1848 = vmatpush.msra.mxu1 %v1711_v60  ;;  %4383 = vmatmul.msk.f32.vlgmr.msrb.gmra.mxu3 %vm282_vm0, %v494_v40 }
 0x212   : > { %1849 = vmatpush.msra.mxu1 %v5238_v28  ;;  %v5318_v28 = vpop.permute.xlu2 %2287 }
 0x213   : > { %4386 = vmatmul.msk.f32.vlgmr.msrb.gmra.mxu2 %vm282_vm0, %v497_v27  ;;  %4384 = vmatmul.msk.f32.vlgmr.msrb.gmra.mxu1 %vm282_vm0, %v495_v56 }
 0x216   : > { %v462_v11 = vpop.f32.mrf.mxu3 }
 0x217   : > { %v2604_v19 = vperm.slane %v462_v11, 0  ;;  %v2625_v50 = vperm.slane %v462_v11, 3  ;;  %v2618_v29 = vperm.slane %v462_v11, 2  ;;  %v2646_v60 = vperm.slane %v462_v11, 6 }
 0x218   : > { %4387 = vmatmul.msk.f32.vlgmr.msra.gmra.mxu3 %vm282_vm0, %v498_v61  ;;  %v2611_v40 = vperm.slane %v462_v11, 1  ;;  %v2639_v56 = vperm.slane %v462_v11, 5 }
 0x21a   : > { %v5320_v23 = vpop.permute.xlu2 %2308 }
 0x21b   : > { %4385 = vmatmul.msk.f32.vlgmr.msra.gmra.mxu1 %vm282_vm0, %v496_v1  ;;  %v2632_v1 = vperm.slane %v462_v11, 4 }
 0x222   : > { %v5316_v53 = vpop.f32.mrf.mxu3  ;;  %v5322_v45 = vpop.permute.xlu2 %2329 }
 0x223   : > { %v2667_v61 = vperm.slane %v5316_v53, 1 }
 0x22a   : > { %v5324_v47 = vpop.permute.xlu2 %2350 }
 0x22b   : > { %6774 = vst [vmem:[#allocation14_spill] sm:$0xff] %v5324_v47 }
 0x232   : > { %v5326_v42 = vpop.permute.xlu2 %2371 }
 0x233   : > { %6775 = vst [vmem:[#allocation15_spill] sm:$0xff] %v5326_v42 }
 0x23a   : > { %v5328_v57 = vpop.permute.xlu2 %2392 }
 0x242   : > { %v5330_v32 = vpop.permute.xlu2 %2413 }
 0x24a   : > { %v5332_v3 = vpop.permute.xlu2 %2434 }
 0x252   : > { %v5334_v33 = vpop.permute.xlu2 %2455 }
 0x25a   : > { %v5336_v49 = vpop.permute.xlu2 %2476 }
 0x262   : > { %v5338_v13 = vpop.permute.xlu2 %2497 }
 0x263   : > { %6776 = vst [vmem:[#allocation16_spill] sm:$0xff] %v5338_v13 }
 0x26a   : > { %v5340_v39 = vpop.permute.xlu2 %2518 }
 0x26b   : > { %6777 = vst [vmem:[#allocation17_spill] sm:$0xff] %v5340_v39 }
 0x272   : > { %v5342_v22 = vpop.permute.xlu2 %2539 }
 0x273   : > { %6778 = vst [vmem:[#allocation18_spill] sm:$0xff] %v5342_v22 }
 0x27a   : > { %v5344_v27 = vpop.permute.xlu2 %2560 }
 0x287   : > { %v1759_v15 = vpop.f32.mrf.mxu1 }
 0x288   : > { %1932 = vxpose.xlu2.b32.start.end [1/1] (short) (narrow) %v1759_v15, 8  ;;  %v5347_v15 = vpop.permute.xlu2 %2581 }
 0x28b   : > { %v1736_v31 = vpop.f32.mrf.mxu3 }
 0x28c   : > { %1900 = vxpose.xlu1.b32.start.end [1/1] (short) (narrow) %v1736_v31, 8  ;;  %v2660_v31 = vperm.slane %v5316_v53, 0 }
 0x28e   : > { %v1782_v34 = vpop.f32.mrf.mxu2 }
 0x28f   : > { %1964 = vxpose.xlu0.b32.start.end [1/1] (short) (narrow) %v1782_v34, 8  ;;  %v2688_v34 = vperm.slane %v5316_v53, 4 }
 0x290   : > { %v1828_v2 = vpop.f32.mrf.mxu1 }
 0x291   : > { %2028 = vxpose.xlu2.b32.start.end [1/1] (short) (narrow) %v1828_v2, 8  ;;  %v2653_v2 = vperm.slane %v462_v11, 7 }
 0x293   : > { %v1805_v21 = vpop.f32.mrf.mxu3 }
 0x294   : > { %1996 = vxpose.xlu1.b32.start.end [1/1] (short) (narrow) %v1805_v21, 8  ;;  %v2681_v21 = vperm.slane %v5316_v53, 3 }
 0x296   : > { %v1874_v10 = vpop.f32.mrf.mxu2 }
 0x298   : > { %v1851_v37 = vpop.f32.mrf.mxu1 }
 0x299   : > { %2060 = vxpose.xlu0.b32.start.end [1/1] (short) (narrow) %v1851_v37, 8  ;;  %v5352_v37 = vpop.permute.xlu2 %2602 }
 0x29b   : > { %v1897_v59 = vpop.f32.mrf.mxu3 }
 0x29c   : > { %2092 = vxpose.xlu1.b32.start.end [1/1] (short) (narrow) %v1874_v10, 8  ;;  %2124 = vxpose.xlu2.b32.start.end [1/1] (short) (narrow) %v1897_v59, 8  ;;  %v2709_v10 = vperm.slane %v5316_v53, 7  ;;  %v2674_v59 = vperm.slane %v5316_v53, 2 }
 0x2f6   : > { %2609 = vperm.xlu1 %4584, %v2604_v19   ;;  %v2702_v19 = vperm.slane %v5316_v53, 6 }
 0x2fe   : > { %2630 = vperm.xlu1 %4584, %v2625_v50  }
 0x305   : > { %2623 = vperm.xlu2 %4585, %v2618_v29   ;;  %v2695_v29 = vperm.slane %v5316_v53, 5 }
 0x306   : > { %2651 = vperm.xlu1 %4584, %v2646_v60  }
 0x307   : > { %2616 = vperm.xlu0 %4583, %v2611_v40  }
 0x30d   : > { %2644 = vperm.xlu2 %4585, %v2639_v56  }
 0x30e   : > { %2672 = vperm.xlu1 %4584, %v2667_v61  }
 0x30f   : > { %2637 = vperm.xlu0 %4583, %v2632_v1  }
 0x315   : > { %2665 = vperm.xlu2 %4585, %v2660_v31  }
 0x316   : > { %2693 = vperm.xlu1 %4584, %v2688_v34  }
 0x317   : > { %2658 = vperm.xlu0 %4583, %v2653_v2  }
 0x31d   : > { %2686 = vperm.xlu2 %4585, %v2681_v21  }
 0x31e   : > { %2714 = vperm.xlu1 %4584, %v2709_v10  }
 0x31f   : > { %2679 = vperm.xlu0 %4583, %v2674_v59  }
 0x321   : > { %v1948_v50 = vpop.trf.xlu2 }
 0x322   : > { %v2170_v1 = vrot.slane %v1948_v50, 4 }
 0x325   : > { %2707 = vperm.xlu2 %4585, %v2702_v19  }
 0x327   : > { %2700 = vperm.xlu0 %4583, %v2695_v29  }
 0x32a   : > { %v2044_v11 = vpop.trf.xlu2 }
 0x330   : > { %v1916_v60 = vpop.trf.xlu1 }
 0x331   : > { %v2158_v56 = vrot.slane %v1916_v60, 4 }
 0x333   : > { %v1980_v40 = vpop.trf.xlu0 }
 0x334   : > { %v2156_v61 = vrot.slane %v1980_v40, 4  ;;  %v2159_v34 = vsel %vm756_vm1, %v1980_v40, %v2158_v56  ;;  %v2182_v40 = vrot.slane %v2044_v11, 4 }
 0x335   : > { %v2140_v21 = vpop.trf.xlu2  ;;  %v2167_v53 = vperm.slane %v2159_v34, %v4904_v44 }
 0x336   : > { %v2157_v31 = vsel %vm756_vm1, %v2156_v61, %v1916_v60  ;;  %v2192_v36 = vrot.slane %v2140_v21, 4 }
 0x337   : > { %v2163_v10 = vperm.slane %v2157_v31, %v4904_v44  ;;  %v2218_v31 = vrot.slane %v2167_v53, 4 }
 0x338   : > { %v2012_v2 = vpop.trf.xlu1 }
 0x339   : > { %v2168_v59 = vrot.slane %v2012_v2, 4  ;;  %v2171_v19 = vsel %vm756_vm1, %v2012_v2, %v2170_v1  ;;  %v2206_v60 = vrot.slane %v2163_v10, 4 }
 0x33a   : > { %v2179_v29 = vperm.slane %v2171_v19, %v4904_v44 }
 0x33b   : > { %v2169_v22 = vsel %vm756_vm1, %v2168_v59, %v1948_v50 }
 0x33c   : > { %v2175_v39 = vperm.slane %v2169_v22, %v4904_v44  ;;  %v2216_v55 = vrot.slane %v2179_v29, 4 }
 0x33d   : > { %v2076_v61 = vpop.trf.xlu0 }
 0x33e   : > { %v2217_v56 = vsel %vm756_vm1, %v2216_v55, %v2167_v53  ;;  %v2194_v30 = vrot.slane %v2076_v61, 4  ;;  %v2193_v13 = vsel %vm756_vm1, %v2192_v36, %v2076_v61  ;;  %v2204_v1 = vrot.slane %v2175_v39, 4 }
 0x33f   : > { %v2223_v34 = vperm.slane %v2217_v56, %v4910_v0  ;;  %v2207_v50 = vsel %vm756_vm1, %v2175_v39, %v2206_v60  ;;  %v2199_v22 = vperm.slane %v2193_v13, %v4904_v44  ;;  %v2219_v55 = vsel %vm756_vm1, %v2179_v29, %v2218_v31 }
 0x340   : > { %v2195_v2 = vsel %vm756_vm1, %v2140_v21, %v2194_v30  ;;  %v2108_v19 = vpop.trf.xlu1  ;;  %v2205_v61 = vsel %vm756_vm1, %v2204_v1, %v2163_v10  ;;  %v5378_v56 = vperm.slane %v2207_v50, %v4910_v0  ;;  %v5385_v29 = vperm.slane %v2219_v55, %v4910_v0 }
 0x341   : > { %v2203_v59 = vperm.slane %v2195_v2, %v4904_v44  ;;  %v2180_v9 = vrot.slane %v2108_v19, 4  ;;  %v2183_v18 = vsel %vm756_vm1, %v2108_v19, %v2182_v40  ;;  %v2262_v30 = vrot.slane %v2223_v34, 4 }
 0x342   : > { %v2191_v36 = vperm.slane %v2183_v18, %v4904_v44  ;;  %v2228_v21 = vrot.slane %v2199_v22, 4  ;;  %v5389_v31 = vperm.slane %v2205_v61, %v4910_v0  ;;  %v2258_v19 = vrot.slane %v5378_v56, 4 }
 0x343   : > { %v2240_v53 = vrot.slane %v2203_v59, 4  ;;  %v2181_v39 = vsel %vm756_vm1, %v2180_v9, %v2044_v11 }
 0x344   : > { %v2187_v13 = vperm.slane %v2181_v39, %v4904_v44  ;;  %v2242_v2 = vrot.slane %v2191_v36, 4 }
 0x345   : > { %v2241_v60 = vsel %vm756_vm1, %v2240_v53, %v2191_v36 }
 0x346   : > { %v2247_v40 = vperm.slane %v2241_v60, %v4910_v0  ;;  %v2230_v18 = vrot.slane %v2187_v13, 4  ;;  %v2243_v10 = vsel %vm756_vm1, %v2203_v59, %v2242_v2  ;;  %v2229_v50 = vsel %vm756_vm1, %v2228_v21, %v2187_v13 }
 0x347   : > { %v5392_v1 = vperm.slane %v2243_v10, %v4910_v0  ;;  %v5408_v21 = vperm.slane %v2229_v50, %v4910_v0 }
 0x348   : > { %v2260_v9 = vrot.slane %v2247_v40, 4  ;;  %v2263_v11 = vsel %vm756_vm1, %v2247_v40, %v2262_v30  ;;  %v2231_v53 = vsel %vm756_vm1, %v2199_v22, %v2230_v18 }
 0x349   : > { %v2759_v55 = vrot.slane %v2263_v11, 1  ;;  %v5399_v36 = vperm.slane %v2231_v53, %v4910_v0  ;;  %v2760_v61 = vrot.slane %v2263_v11, 2  ;;  %v2761_v39 = vrot.slane %v2263_v11, 3 }
 0x34a   : > { %v5402_v59 = vsel %vm756_vm1, %v2260_v9, %v2223_v34  ;;  %v2264_v60 = vrot.slane %v5392_v1, 4  ;;  %v2762_v2 = vrot.slane %v2263_v11, 4  ;;  %v2763_v10 = vrot.slane %v2263_v11, 5 }
 0x34b   : > { %6779 = vst [vmem:[#allocation19_spill] sm:$0xff] %v5402_v59  ;;  %v2764_v22 = vrot.slane %v2263_v11, 6  ;;  %v2765_v18 = vrot.slane %v2263_v11, 7  ;;  %v2820_v53 = vperm.slane %v2263_v11, 0  ;;  %v2821_v34 = vperm.slane %v2759_v55, 0 }
 0x34c   : > { %v2259_v9 = vsel %vm756_vm1, %v5399_v36, %v2258_v19  ;;  %v2822_v59 = vperm.slane %v2760_v61, 0  ;;  %v2823_v20 = vperm.slane %v2761_v39, 0  ;;  %v2824_v42 = vperm.slane %v2762_v2, 0 }
 0x34d   : > { %v5415_v30 = vsel %vm756_vm1, %v2264_v60, %v5385_v29  ;;  %v2825_v40 = vperm.slane %v2763_v10, 0  ;;  %v2826_v16 = vperm.slane %v2764_v22, 0  ;;  %v2827_v50 = vperm.slane %v2765_v18, 0 }
 0x34e   : > { %v5418_v47 = vadd.f32 %v2820_v53, %v5149_v7  ;;  %v5421_v13 = vadd.f32 %v2821_v34, %v5344_v27  ;;  %v5424_v11 = vadd.f32 %v2822_v59, %v5195_v46  ;;  %v5427_v19 = vadd.f32 %v2823_v20, %v5158_v52 }
 0x34f   : > { %v5430_v55 = vadd.f32 %v2824_v42, %v5347_v15  ;;  %v5433_v61 = vadd.f32 %v2825_v40, %v5227_v14  ;;  %v5436_v39 = vadd.f32 %v2826_v16, %v5166_v41  ;;  %v5439_v7 = vadd.f32 %v2827_v50, %v5352_v37 }
 0x350   : > { %6780 = vst [vmem:[#allocation20_spill] sm:$0xff] %v5424_v11  ;;  %v3532_v27 = vrot.slane %v5424_v11, 4  ;;  %v3544_v46 = vrot.slane %v5427_v19, 4  ;;  %v2745_v59 = vrot.slane %v2259_v9, 1  ;;  %v2746_v60 = vrot.slane %v2259_v9, 2 }
 0x351   : > { %6781 = vst [vmem:[#allocation21_spill] sm:$0xff] %v5427_v19  ;;  %v3556_v20 = vrot.slane %v5436_v39, 4  ;;  %v3568_v52 = vrot.slane %v5439_v7, 4  ;;  %v2747_v42 = vrot.slane %v2259_v9, 3  ;;  %v2748_v15 = vrot.slane %v2259_v9, 4 }
 0x352   : > { %6782 = vst [vmem:[#allocation22_spill] sm:$0xff] %v5436_v39  ;;  %v3533_v14 = vsel %vm756_vm1, %v3532_v27, %v5418_v47  ;;  %v3545_v16 = vsel %vm756_vm1, %v3544_v46, %v5421_v13  ;;  %v2750_v41 = vrot.slane %v2259_v9, 6  ;;  %v2751_v37 = vrot.slane %v2259_v9, 7 }
 0x353   : > { %6783 = vst [vmem:[#allocation23_spill] sm:$0xff] %v5439_v7  ;;  %v5450_v2 = vperm.slane %v3545_v16, %v4904_v44  ;;  %v3557_v10 = vsel %vm756_vm1, %v3556_v20, %v5430_v55  ;;  %v3569_v40 = vsel %vm756_vm1, %v3568_v52, %v5433_v61  ;;  %v2749_v22 = vrot.slane %v2259_v9, 5 }
 0x354   : > { %v5457_v18 = vperm.slane %v3533_v14, %v4904_v44  ;;  %v5460_v53 = vperm.slane %v3569_v40, %v4904_v44  ;;  %v2804_v34 = vperm.slane %v2259_v9, 0  ;;  %v2805_v50 = vperm.slane %v2745_v59, 0 }
 0x355   : > { %v3580_v27 = vrot.slane %v5450_v2, 4  ;;  %v2806_v46 = vperm.slane %v2746_v60, 0  ;;  %v2807_v16 = vperm.slane %v2747_v42, 0  ;;  %v2808_v7 = vperm.slane %v2748_v15, 0 }
 0x356   : > { %6784 = vst [vmem:[#allocation24_spill] sm:$0xff] %v5460_v53  ;;  %v5464_v39 = vperm.slane %v3557_v10, %v4904_v44  ;;  %v3604_v20 = vrot.slane %v5460_v53, 4  ;;  %v2810_v52 = vperm.slane %v2750_v41, 0  ;;  %v2811_v19 = vperm.slane %v2751_v37, 0 }
 0x357   : > { %v3581_v14 = vsel %vm756_vm1, %v3580_v27, %v5457_v18  ;;  %v2809_v11 = vperm.slane %v2749_v22, 0  ;;  %v5470_v40 = vadd.f32 %v2804_v34, %v5132_v63  ;;  %v5473_v9 = vadd.f32 %v2806_v46, %v5334_v33 }
 0x358   : > { %v5476_v59 = vperm.slane %v3581_v14, %v4910_v0  ;;  %v3605_v60 = vsel %vm756_vm1, %v3604_v20, %v5464_v39  ;;  %v5481_v42 = vadd.f32 %v2805_v50, %v5110_v38  ;;  %v5484_v15 = vadd.f32 %v2807_v16, %v5137_v58 }
 0x359   : > { %6785 = vst [vmem:[#allocation25_spill] sm:$0xff] %v5470_v40  ;;  %v5487_v41 = vperm.slane %v3605_v60, %v4910_v0  ;;  %v5490_v63 = vadd.f32 %v2808_v7, %v5120_v51  ;;  %v5493_v33 = vadd.f32 %v2810_v52, %v5143_v62  ;;  %v5496_v37 = vadd.f32 %v2811_v19, %v5129_v26 }
 0x35a   : > { %6786 = vst [vmem:[#allocation26_spill] sm:$0xff] %v5473_v9  ;;  %v3630_v10 = vrot.slane %v5476_v59, 4  ;;  %v3308_v38 = vrot.slane %v5473_v9, 4  ;;  %v3320_v22 = vrot.slane %v5484_v15, 4  ;;  %v2767_v58 = vrot.slane %v5415_v30, 2 }
 0x35b   : > { %6787 = vst [vmem:[#allocation27_spill] sm:$0xff] %v5476_v59  ;;  %v5503_v34 = vadd.f32 %v2809_v11, %v5336_v49  ;;  %v3332_v51 = vrot.slane %v5493_v33, 4  ;;  %v3344_v7 = vrot.slane %v5496_v37, 4  ;;  %v2770_v62 = vrot.slane %v5415_v30, 5 }
 0x35c   : > { %6788 = vst [vmem:[#allocation28_spill] sm:$0xff] %v5481_v42  ;;  %v3631_v26 = vsel %vm756_vm1, %v5487_v41, %v3630_v10  ;;  %v3309_v19 = vsel %vm756_vm1, %v3308_v38, %v5470_v40  ;;  %v3321_v50 = vsel %vm756_vm1, %v3320_v22, %v5481_v42  ;;  %v2830_v27 = vperm.slane %v2767_v58, 0 }
 0x35d   : > { %6789 = vst [vmem:[#allocation29_spill] sm:$0xff] %v5484_v15  ;;  %3886 = vrot.lane.b32.xlu1 %v3631_v26, %s4713_s24  ;;  %v3315_v49 = vperm.slane %v3309_v19, %v4904_v44  ;;  %v3327_v11 = vperm.slane %v3321_v50, %v4904_v44  ;;  %v3333_v46 = vsel %vm756_vm1, %v3332_v51, %v5490_v63  ;;  %v2252_v52 = vrot.slane %v5408_v21, 4 }
 0x35e   : > { %6790 = vst [vmem:[#allocation30_spill] sm:$0xff] %v5487_v41  ;;  %v3345_v16 = vsel %vm756_vm1, %v3344_v7, %v5503_v34  ;;  %v6795_v14 = vrot.slane %v5399_v36, 4  ;;  %v3339_v10 = vperm.slane %v3333_v46, %v4904_v44  ;;  %v6796_v22 = vrot.slane %v5389_v31, 4 }
 0x35f   : > { %6791 = vst [vmem:[#allocation31_spill] sm:$0xff] %v5490_v63  ;;  %v2624_v20 = vpop.permute.xlu2 %2623  ;;  %v3351_v38 = vperm.slane %v3345_v16, %v4904_v44  ;;  %v6797_v51 = vrot.slane %v5385_v29, 4  ;;  %v3356_v26 = vrot.slane %v3327_v11, 4  ;;  %v3358_v36 = vrot.slane %v3315_v49, 4 }
 0x360   : > { %6792 = vst [vmem:[#allocation32_spill] sm:$0xff] %v5493_v33  ;;  %v2257_v60 = vsel %vm756_vm1, %v6795_v14, %v5378_v56  ;;  %v5532_v58 = vsel %vm756_vm1, %v5408_v21, %v6796_v22  ;;  %v2958_v56 = vadd.f32 %v2830_v27, %v2624_v20  ;;  %v3382_v50 = vrot.slane %v3339_v10, 4 }
 0x361   : > { %6793 = vst [vmem:[#allocation33_spill] sm:$0xff] %v5496_v37  ;;  %v5538_v7 = vsel %vm756_vm1, %v5392_v1, %v6797_v51  ;;  %v3380_v19 = vrot.slane %v3351_v38, 4  ;;  %v2833_v46 = vperm.slane %v2770_v62, 0  ;;  %v3357_v16 = vsel %vm756_vm1, %v3356_v26, %v3315_v49 }
 0x362   : > { %6794 = vst [vmem:[#allocation34_spill] sm:$0xff] %v5503_v34  ;;  %v3359_v14 = vsel %vm756_vm1, %v3327_v11, %v3358_v36  ;;  %v2739_v37 = vrot.slane %v2257_v60, 2  ;;  %v2740_v33 = vrot.slane %v2257_v60, 3  ;;  %v5543_v21 = vperm.slane %v3357_v16, %v4910_v0 }
 0x363   : > { %v3381_v29 = vsel %vm756_vm1, %v3380_v19, %v3339_v10  ;;  %v3383_v1 = vsel %vm756_vm1, %v3351_v38, %v3382_v50  ;;  %v2738_v22 = vrot.slane %v2257_v60, 1  ;;  %v2828_v27 = vperm.slane %v5415_v30, 0 }
 0x364   : > { %6798 = vst [vmem:[#allocation35_spill] sm:$0xff] %v5543_v21  ;;  %v5548_v51 = vperm.slane %v3383_v1, %v4910_v0  ;;  %v2741_v62 = vrot.slane %v2257_v60, 4  ;;  %v2743_v20 = vrot.slane %v2257_v60, 6  ;;  %v5552_v49 = vperm.slane %v3381_v29, %v4910_v0 }
 0x365   : > { %v3406_v11 = vrot.slane %v5543_v21, 4  ;;  %v5556_v26 = vperm.slane %v3359_v14, %v4910_v0  ;;  %v2744_v36 = vrot.slane %v2257_v60, 7  ;;  %v2742_v19 = vrot.slane %v2257_v60, 5 }
 0x366   : > { %6799 = vst [vmem:[#allocation36_spill] sm:$0xff] %v5548_v51  ;;  %v3408_v10 = vrot.slane %v5548_v51, 4  ;;  %v2798_v50 = vperm.slane %v2739_v37, 0  ;;  %v2799_v16 = vperm.slane %v2740_v33, 0  ;;  %v5561_v1 = vsel %vm756_vm1, %v2252_v52, %v5389_v31 }
 0x367   : > { %6800 = vst [vmem:[#allocation37_spill] sm:$0xff] %v5552_v49  ;;  %v2645_v38 = vpop.permute.xlu2 %2644  ;;  %v3407_v29 = vsel %vm756_vm1, %v5552_v49, %v3406_v11  ;;  %v2796_v9 = vperm.slane %v2257_v60, 0  ;;  %v2797_v21 = vperm.slane %v2738_v22, 0  ;;  %v2802_v34 = vperm.slane %v2743_v20, 0 }
 0x368   : > { %6801 = vst [vmem:[#allocation38_spill] sm:$0xff] %v5556_v26  ;;  %v2610_v15 = vpop.permute.xlu1 %2609  ;;  %3882 = vrot.lane.b32.xlu0 %v3407_v29, %s4713_s24  ;;  %v3409_v14 = vsel %vm756_vm1, %v3408_v10, %v5556_v26  ;;  %v2803_v63 = vperm.slane %v2744_v36, 0  ;;  %v3644_v37 = vrot.slane %v2958_v56, 4  ;;  %v2800_v31 = vperm.slane %v2741_v62, 0 }
 0x369   : > { %v2956_v51 = vadd.f32 %v2828_v27, %v2610_v15  ;;  %3914 = vrot.lane.b32.xlu1 %v3409_v14, %s4714_s27  ;;  %v5571_v52 = vadd.f32 %v2798_v50, %v5117_v48  ;;  %v5573_v60 = vadd.f32 %v2833_v46, %v2645_v38  ;;  %v2801_v11 = vperm.slane %v2742_v19, 0 }
 0x36a   : > { %v5576_v29 = vadd.f32 %v2799_v16, %v5098_v17  ;;  %v5579_v15 = vadd.f32 %v2796_v9, %v5093_v12  ;;  %v5582_v27 = vadd.f32 %v2797_v21, %v5328_v57  ;;  %v5585_v20 = vadd.f32 %v2802_v34, %v5103_v24 }
 0x36b   : > { %v3646_v22 = vrot.slane %v2956_v51, 4  ;;  %v5588_v62 = vadd.f32 %v2803_v63, %v5332_v3  ;;  %v3645_v48 = vsel %vm756_vm1, %v3644_v37, %v2956_v51  ;;  %v3196_v36 = vrot.slane %v5571_v52, 4 }
 0x36c   : > { %v3208_v17 = vrot.slane %v5576_v29, 4  ;;  %v5596_v9 = vadd.f32 %v2800_v31, %v5330_v32  ;;  %v3220_v57 = vrot.slane %v5585_v20, 4  ;;  %v5602_v63 = vadd.f32 %v2801_v11, %v5124_v54 }
 0x36d   : > { %v3647_v46 = vsel %vm756_vm1, %v2958_v56, %v3646_v22  ;;  %v3232_v24 = vrot.slane %v5588_v62, 4  ;;  %v3197_v34 = vsel %vm756_vm1, %v3196_v36, %v5579_v15  ;;  %v5609_v21 = vperm.slane %v3645_v48, %v4904_v44 }
 0x36e   : > { %v3209_v56 = vsel %vm756_vm1, %v3208_v17, %v5582_v27  ;;  %v3221_v51 = vsel %vm756_vm1, %v3220_v57, %v5596_v9  ;;  %v2836_v10 = vperm.slane %v5538_v7, 0  ;;  %v5618_v19 = vperm.slane %v3197_v34, %v4904_v44 }
 0x36f   : > { %v5612_v32 = vperm.slane %v3209_v56, %v4904_v44  ;;  %v2666_v38 = vpop.permute.xlu2 %2665  ;;  %v3233_v50 = vsel %vm756_vm1, %v3232_v24, %v5602_v63  ;;  %v2768_v16 = vrot.slane %v5415_v30, 3  ;;  %v2724_v14 = vrot.slane %v5561_v1, 1 }
 0x370   : > { %v2631_v54 = vpop.permute.xlu1 %2630  ;;  %v5625_v37 = vperm.slane %v3233_v50, %v4904_v44  ;;  %v2725_v22 = vrot.slane %v5561_v1, 2  ;;  %v2726_v11 = vrot.slane %v5561_v1, 3  ;;  %v5631_v48 = vperm.slane %v3647_v46, %v4904_v44 }
 0x371   : > { %v3244_v31 = vrot.slane %v5612_v32, 4  ;;  %v5634_v36 = vperm.slane %v3221_v51, %v4904_v44  ;;  %v2727_v17 = vrot.slane %v5561_v1, 4  ;;  %v2728_v57 = vrot.slane %v5561_v1, 5 }
 0x372   : > { %6802 = vst [vmem:[#allocation39_spill] sm:$0xff] %v5631_v48  ;;  %v3268_v34 = vrot.slane %v5625_v37, 4  ;;  %v2729_v56 = vrot.slane %v5561_v1, 6  ;;  %v2730_v50 = vrot.slane %v5561_v1, 7  ;;  %v2831_v46 = vperm.slane %v2768_v16, 0 }
 0x373   : > { %v3245_v24 = vsel %vm756_vm1, %v3244_v31, %v5618_v19  ;;  %v2780_v51 = vperm.slane %v5561_v1, 0  ;;  %v2781_v33 = vperm.slane %v2724_v14, 0  ;;  %v2782_v48 = vperm.slane %v2725_v22, 0 }
 0x374   : > { %v5644_v12 = vperm.slane %v3245_v24, %v4910_v0  ;;  %v3269_v3 = vsel %vm756_vm1, %v3268_v34, %v5634_v36  ;;  %v2783_v49 = vperm.slane %v2726_v11, 0  ;;  %v2784_v26 = vperm.slane %v2727_v17, 0 }
 0x375   : > { %v5650_v31 = vperm.slane %v3269_v3, %v4910_v0  ;;  %v2785_v59 = vperm.slane %v2728_v57, 0  ;;  %v2786_v42 = vperm.slane %v2729_v56, 0  ;;  %v5653_v40 = vadd.f32 %v2836_v10, %v2666_v38 }
 0x376   : > { %6803 = vst [vmem:[#allocation40_spill] sm:$0xff] %v5644_v12  ;;  %v3294_v41 = vrot.slane %v5644_v12, 4  ;;  %v2959_v24 = vadd.f32 %v2831_v46, %v2631_v54  ;;  %v2787_v16 = vperm.slane %v2730_v50, 0  ;;  %v5656_v1 = vadd.f32 %v2782_v48, %v5318_v28 }
 0x377   : > { %6804 = vst [vmem:[#allocation41_spill] sm:$0xff] %v5650_v31  ;;  %v5661_v11 = vadd.f32 %v2780_v51, %v5075_v25  ;;  %v5664_v3 = vadd.f32 %v2781_v33, %v5077_v4  ;;  %v5667_v17 = vadd.f32 %v2783_v49, %v5081_v35  ;;  %v5671_v38 = vadd.f32 %v2784_v26, %v5085_v6  ;;  %v2687_v54 = vpop.permute.xlu2 %2686 }
 0x378   : > { %6805 = vst [vmem:[#allocation42_spill] sm:$0xff] %v5656_v1  ;;  %v2652_v14 = vpop.permute.xlu1 %2651  ;;  %v3295_v22 = vsel %vm756_vm1, %v5650_v31, %v3294_v41  ;;  %v5674_v28 = vadd.f32 %v2786_v42, %v5090_v8  ;;  %v5677_v41 = vadd.f32 %v2787_v16, %v5079_v43  ;;  %v2972_v25 = vrot.slane %v5656_v1, 4 }
 0x379   : > { %v2617_v10 = vpop.permute.xlu0 %2616  ;;  %3880 = vrot.lane.b32.xlu1 %v3295_v22, %s4713_s24  ;;  %6806 = vst [vmem:[#allocation43_spill] sm:$0xff] %v5671_v38  ;;  %v5681_v4 = vadd.f32 %v2785_v59, %v5320_v23  ;;  %v2984_v35 = vrot.slane %v5667_v17, 4  ;;  %v2775_v49 = vrot.slane %v5538_v7, 3  ;;  %v2766_v33 = vrot.slane %v5415_v30, 1 }
 0x37a   : > { %6807 = vst [vmem:[#allocation44_spill] sm:$0xff] %v5674_v28  ;;  %v2973_v6 = vsel %vm756_vm1, %v2972_v25, %v5661_v11  ;;  %v2996_v8 = vrot.slane %v5674_v28, 4  ;;  %v3008_v43 = vrot.slane %v5677_v41, 4  ;;  %v2771_v42 = vrot.slane %v5415_v30, 6 }
 0x37b   : > { %6808 = vst [vmem:[#allocation45_spill] sm:$0xff] %v5677_v41  ;;  %v3656_v26 = vrot.slane %v2959_v24, 4  ;;  %v5692_v48 = vperm.slane %v2973_v6, %v4904_v44  ;;  %v2985_v23 = vsel %vm756_vm1, %v2984_v35, %v5664_v3  ;;  %v2839_v59 = vperm.slane %v2775_v49, 0 }
 0x37c   : > { %6809 = vst [vmem:[#allocation46_spill] sm:$0xff] %v5681_v4  ;;  %v2997_v57 = vsel %vm756_vm1, %v2996_v8, %v5671_v38  ;;  %v3009_v34 = vsel %vm756_vm1, %v3008_v43, %v5681_v4  ;;  %v2829_v56 = vperm.slane %v2766_v33, 0  ;;  %v2834_v50 = vperm.slane %v2771_v42, 0 }
 0x37d   : > { %v5701_v46 = vperm.slane %v2985_v23, %v4904_v44  ;;  %v5704_v51 = vperm.slane %v2997_v57, %v4904_v44  ;;  %v3022_v16 = vrot.slane %v5692_v48, 4  ;;  %v2967_v22 = vadd.f32 %v2839_v59, %v2687_v54 }
 0x37e   : > { %v5708_v25 = vperm.slane %v3009_v34, %v4904_v44  ;;  %v2957_v35 = vadd.f32 %v2829_v56, %v2617_v10  ;;  %v2962_v49 = vadd.f32 %v2834_v50, %v2652_v14  ;;  %v2769_v6 = vrot.slane %v5415_v30, 4 }
 0x37f   : > { %v3023_v33 = vsel %vm756_vm1, %v5701_v46, %v3022_v16  ;;  %v3046_v43 = vrot.slane %v5704_v51, 4  ;;  %v2778_v42 = vrot.slane %v5538_v7, 6  ;;  %v2773_v57 = vrot.slane %v5538_v7, 1  ;;  %v2708_v28 = vpop.permute.xlu2 %2707 }
 0x380   : > { %v2673_v8 = vpop.permute.xlu1 %2672  ;;  %v3694_v54 = vrot.slane %v5609_v21, 4  ;;  %v3657_v10 = vsel %vm756_vm1, %v3656_v26, %v2957_v35  ;;  %v3658_v14 = vrot.slane %v2957_v35, 4  ;;  %v5720_v34 = vperm.slane %v3023_v33, %v4910_v0 }
 0x381   : > { %v2638_v23 = vpop.permute.xlu0 %2637  ;;  %v3047_v56 = vsel %vm756_vm1, %v5708_v25, %v3046_v43  ;;  %v3768_v50 = vrot.slane %v2967_v22, 4  ;;  %v2832_v16 = vperm.slane %v2769_v6, 0  ;;  %v2837_v4 = vperm.slane %v2773_v57, 0 }
 0x382   : > { %6810 = vst [vmem:[#allocation47_spill] sm:$0xff] %v5720_v34  ;;  %v5725_v12 = vperm.slane %v3047_v56, %v4910_v0  ;;  %v3659_v41 = vsel %vm756_vm1, %v2959_v24, %v3658_v14  ;;  %v2772_v59 = vrot.slane %v5415_v30, 7  ;;  %v3663_v26 = vperm.slane %v3657_v10, %v4904_v44 }
 0x383   : > { %v3668_v35 = vrot.slane %v2962_v49, 4  ;;  %v2842_v38 = vperm.slane %v2778_v42, 0  ;;  %v2960_v33 = vadd.f32 %v2832_v16, %v2638_v23  ;;  %v5732_v43 = vperm.slane %v3659_v41, %v4904_v44 }
 0x384   : > { %6811 = vst [vmem:[#allocation48_spill] sm:$0xff] %v5725_v12  ;;  %v3072_v1 = vrot.slane %v5725_v12, 4  ;;  %v2965_v6 = vadd.f32 %v2837_v4, %v2673_v8  ;;  %v2776_v56 = vrot.slane %v5538_v7, 4  ;;  %v2835_v10 = vperm.slane %v2772_v59, 0  ;;  %v6844_v12 = vld [vmem:[#allocation9_spill] sm:$0xff] }
 0x385   : > { %6812 = vst [vmem:[#allocation49_spill] sm:$0xff] %v5732_v43  ;;  %v2970_v24 = vadd.f32 %v2842_v38, %v2708_v28  ;;  %v3669_v57 = vsel %vm756_vm1, %v3668_v35, %v2960_v33  ;;  %v3670_v14 = vrot.slane %v2960_v33, 4  ;;  %v3692_v4 = vrot.slane %v3663_v26, 4 }
 0x386   : > { %v3073_v30 = vsel %vm756_vm1, %v3072_v1, %v5720_v34  ;;  %v3769_v42 = vsel %vm756_vm1, %v3768_v50, %v2965_v6  ;;  %v3770_v23 = vrot.slane %v2965_v6, 4  ;;  %v2840_v38 = vperm.slane %v2776_v56, 0 }
 0x387   : > { %3908 = vrot.lane.b32.xlu1 %v3073_v30, %s4714_s27  ;;  %v3671_v8 = vsel %vm756_vm1, %v2962_v49, %v3670_v14  ;;  %v3675_v35 = vperm.slane %v3669_v57, %v4904_v44  ;;  %v3780_v50 = vrot.slane %v2970_v24, 4  ;;  %v5747_v59 = vperm.slane %v3769_v42, %v4904_v44 }
 0x388   : > { %v2694_v16 = vpop.permute.xlu1 %2693  ;;  %v3771_v1 = vsel %vm756_vm1, %v2967_v22, %v3770_v23  ;;  %v2774_v41 = vrot.slane %v5538_v7, 2  ;;  %v6814_v56 = vrot.slane %v5573_v60, 4  ;;  %v2779_v57 = vrot.slane %v5538_v7, 7 }
 0x389   : > { %v2659_v53 = vpop.permute.xlu0 %2658  ;;  %v2968_v6 = vadd.f32 %v2840_v38, %v2694_v16  ;;  %v5751_v30 = vperm.slane %v3771_v1, %v4904_v44  ;;  %v5758_v22 = vperm.slane %v3671_v8, %v4904_v44  ;;  %v3695_v1 = vsel %vm756_vm1, %v3663_v26, %v3694_v54 }
 0x38a   : > { %v2963_v33 = vadd.f32 %v2835_v10, %v2659_v53  ;;  %v3718_v10 = vrot.slane %v3675_v35, 4  ;;  %v5778_v31 = vperm.slane %v3695_v1, %v4910_v0  ;;  %v2777_v1 = vrot.slane %v5538_v7, 5 }
 0x38b   : > { %6813 = vst [vmem:[#allocation50_spill] sm:$0xff] %v5751_v30  ;;  %v3781_v42 = vsel %vm756_vm1, %v3780_v50, %v2968_v6  ;;  %v3782_v23 = vrot.slane %v2968_v6, 4  ;;  %v2843_v6 = vperm.slane %v2779_v57, 0  ;;  %v2733_v7 = vrot.slane %v5532_v58, 3 }
 0x38c   : > { %v3680_v49 = vrot.slane %v2963_v33, 4  ;;  %v3683_v14 = vsel %vm756_vm1, %v2963_v33, %v6814_v56  ;;  %6815 = vst [vmem:[#allocation51_spill] sm:$0xff] %v5758_v22  ;;  %v5767_v38 = vperm.slane %v3781_v42, %v4904_v44 }
 0x38d   : > { %v5761_v53 = vperm.slane %v3683_v14, %v4904_v44  ;;  %v3783_v56 = vsel %vm756_vm1, %v2970_v24, %v3782_v23  ;;  %v2838_v14 = vperm.slane %v2774_v41, 0  ;;  %6817 = vst [vmem:[#allocation53_spill] sm:$0xff] %v5778_v31 }
 0x38e   : > { %v3681_v16 = vsel %vm756_vm1, %v3680_v49, %v5573_v60  ;;  %v3693_v60 = vsel %vm756_vm1, %v3692_v4, %v5609_v21  ;;  %v5785_v24 = vperm.slane %v3783_v56, %v4904_v44 }
 0x38f   : > { %6816 = vst [vmem:[#allocation52_spill] sm:$0xff] %v5761_v53  ;;  %v3687_v8 = vperm.slane %v3681_v16, %v4904_v44  ;;  %v5782_v26 = vperm.slane %v3693_v60, %v4910_v0  ;;  %v6821_v60 = vrot.slane %v5653_v40, 4 }
 0x390   : > { %6819 = vst [vmem:[#allocation55_spill] sm:$0xff] %v5785_v24  ;;  %v2715_v57 = vpop.permute.xlu1 %2714 }
 0x391   : > { %v3716_v49 = vrot.slane %v3687_v8, 4  ;;  %v2680_v42 = vpop.permute.xlu0 %2679  ;;  %v3719_v54 = vsel %vm756_vm1, %v3687_v8, %v3718_v10  ;;  %6818 = vst [vmem:[#allocation54_spill] sm:$0xff] %v5782_v26  ;;  %v3742_v4 = vrot.slane %v5782_v26, 4  ;;  %v2731_v10 = vrot.slane %v5532_v58, 1 }
 0x392   : > { %v2966_v23 = vadd.f32 %v2838_v14, %v2680_v42  ;;  %v5789_v16 = vperm.slane %v3719_v54, %v4910_v0  ;;  %v2791_v26 = vperm.slane %v2733_v7, 0  ;;  %v6830_v7 = vld [vmem:[#allocation15_spill] sm:$0xff] }
 0x393   : > { %v3717_v21 = vsel %vm756_vm1, %v3716_v49, %v3675_v35  ;;  %v2971_v35 = vadd.f32 %v2843_v6, %v2715_v57  ;;  %v2732_v49 = vrot.slane %v5532_v58, 2  ;;  %v2841_v6 = vperm.slane %v2777_v1, 0 }
 0x394   : > { %6820 = vst [vmem:[#allocation56_spill] sm:$0xff] %v5789_v16  ;;  %v3756_v8 = vrot.slane %v2966_v23, 4  ;;  %v3759_v56 = vsel %vm756_vm1, %v2966_v23, %v6821_v60  ;;  %v3744_v28 = vrot.slane %v5789_v16, 4  ;;  %v5800_v14 = vperm.slane %v3717_v21, %v4910_v0 }
 0x395   : > { %v5803_v42 = vperm.slane %v3759_v56, %v4904_v44  ;;  %v2734_v21 = vrot.slane %v5532_v58, 4  ;;  %v2735_v57 = vrot.slane %v5532_v58, 5  ;;  %v2736_v56 = vrot.slane %v5532_v58, 6 }
 0x396   : > { %6822 = vst [vmem:[#allocation57_spill] sm:$0xff] %v5800_v14  ;;  %v3757_v54 = vsel %vm756_vm1, %v3756_v8, %v5653_v40  ;;  %v3745_v50 = vsel %vm756_vm1, %v3744_v28, %v5778_v31  ;;  %v3743_v23 = vsel %vm756_vm1, %v5800_v14, %v3742_v4  ;;  %v2737_v40 = vrot.slane %v5532_v58, 7 }
 0x397   : > { %6823 = vst [vmem:[#allocation58_spill] sm:$0xff] %v5803_v42  ;;  %3920 = vrot.lane.b32.xlu1 %v3745_v50, %s4714_s27  ;;  %3888 = vrot.lane.b32.xlu0 %v3743_v23, %s4713_s24  ;;  %v2788_v28 = vperm.slane %v5532_v58, 0  ;;  %v2789_v8 = vperm.slane %v2731_v10, 0  ;;  %v2790_v41 = vperm.slane %v2732_v49, 0  ;;  %v5822_v4 = vperm.slane %v3757_v54, %v4904_v44  ;;  %v6826_v10 = vld [vmem:[#allocation14_spill] sm:$0xff] }
 0x398   : > { %v3792_v33 = vrot.slane %v2971_v35, 4  ;;  %v2792_v1 = vperm.slane %v2734_v21, 0  ;;  %v2794_v14 = vperm.slane %v2736_v56, 0  ;;  %v2795_v24 = vperm.slane %v2737_v40, 0  ;;  %v6828_v42 = vld [vmem:[#allocation6_spill] sm:$0xff] }
 0x399   : > { %v2701_v50 = vpop.permute.xlu0 %2700  ;;  %v2793_v30 = vperm.slane %v2735_v57, 0  ;;  %v5826_v16 = vadd.f32 %v2788_v28, %v5322_v45  ;;  %v5829_v58 = vadd.f32 %v2790_v41, %v5083_v5  ;;  %v5832_v49 = vadd.f32 %v2791_v26, %v6826_v10  ;;  %v6832_v45 = vld [vmem:[#allocation8_spill] sm:$0xff]  ;;  %v6837_v28 = vld [vmem:[#allocation5_spill] sm:$0xff]  ;;  %v6839_v10 = vld [vmem:[#allocation19_spill] sm:$0xff] }
 0x39a   : > { %v2969_v23 = vadd.f32 %v2841_v6, %v2701_v50  ;;  %v5836_v31 = vadd.f32 %v2789_v8, %v6828_v42  ;;  %v5839_v21 = vadd.f32 %v2794_v14, %v6830_v7  ;;  %v5845_v57 = vadd.f32 %v2795_v24, %v6832_v45 }
 0x39b   : > { %6824 = vst [vmem:[#allocation59_spill] sm:$0xff] %v5826_v16  ;;  %v3084_v5 = vrot.slane %v5829_v58, 4  ;;  %v3096_v26 = vrot.slane %v5832_v49, 4  ;;  %v6836_v14 = vrot.slane %v5747_v59, 4  ;;  %v5862_v8 = vadd.f32 %v2793_v30, %v6837_v28 }
 0x39c   : > { %6825 = vst [vmem:[#allocation60_spill] sm:$0xff] %v5829_v58  ;;  %v3793_v54 = vsel %vm756_vm1, %v3792_v33, %v2969_v23  ;;  %v3794_v60 = vrot.slane %v2969_v23, 4  ;;  %v6834_v33 = vld [vmem:[#allocation7_spill] sm:$0xff]  ;;  %v3108_v42 = vrot.slane %v5839_v21, 4 }
 0x39d   : > { %6827 = vst [vmem:[#allocation14_spill] sm:$0xff] %v5832_v49  ;;  %v5842_v6 = vperm.slane %v3793_v54, %v4904_v44  ;;  %v5853_v56 = vadd.f32 %v2792_v1, %v6834_v33  ;;  %v3805_v40 = vsel %vm756_vm1, %v6836_v14, %v5822_v4  ;;  %v3085_v50 = vsel %vm756_vm1, %v3084_v5, %v5826_v16 }
 0x39e   : > { %6829 = vst [vmem:[#allocation6_spill] sm:$0xff] %v5836_v31  ;;  %v5850_v41 = vsel %vm756_vm1, %v2971_v35, %v3794_v60  ;;  %v3097_v35 = vsel %vm756_vm1, %v3096_v26, %v5836_v31  ;;  %v3091_v60 = vperm.slane %v3085_v50, %v4904_v44  ;;  %v3120_v1 = vrot.slane %v5845_v57, 4 }
 0x39f   : > { %6831 = vst [vmem:[#allocation15_spill] sm:$0xff] %v5839_v21  ;;  %v3828_v24 = vrot.slane %v5842_v6, 4  ;;  %v3109_v23 = vsel %vm756_vm1, %v3108_v42, %v5853_v56  ;;  %v2752_v54 = vrot.slane %v6839_v10, 1  ;;  %v3103_v7 = vperm.slane %v3097_v35, %v4904_v44 }
 0x3a0   : > { %6833 = vst [vmem:[#allocation8_spill] sm:$0xff] %v5845_v57  ;;  %v3115_v30 = vperm.slane %v3109_v23, %v4904_v44  ;;  %v5876_v45 = vperm.slane %v3805_v40, %v4910_v0  ;;  %v3121_v26 = vsel %vm756_vm1, %v3120_v1, %v5862_v8  ;;  %v3134_v33 = vrot.slane %v3091_v60, 4 }
 0x3a1   : > { %6835 = vst [vmem:[#allocation7_spill] sm:$0xff] %v5853_v56  ;;  %v3829_v5 = vsel %vm756_vm1, %v3828_v24, %v5767_v38  ;;  %v2753_v14 = vrot.slane %v6839_v10, 2  ;;  %v3127_v28 = vperm.slane %v3121_v26, %v4904_v44  ;;  %v2754_v40 = vrot.slane %v6839_v10, 3 }
 0x3a2   : > { %6838 = vst [vmem:[#allocation5_spill] sm:$0xff] %v5862_v8  ;;  %v5883_v42 = vperm.slane %v3829_v5, %v4910_v0  ;;  %v3158_v50 = vrot.slane %v3115_v30, 4  ;;  %v3854_v35 = vrot.slane %v5876_v45, 4  ;;  %v3806_v23 = vrot.slane %v5822_v4, 4 }
 0x3a3   : > { %6840 = vst [vmem:[#allocation19_spill] sm:$0xff] %v5876_v45  ;;  %v3135_v24 = vsel %vm756_vm1, %v3103_v7, %v3134_v33  ;;  %v2755_v57 = vrot.slane %v6839_v10, 4  ;;  %v2756_v1 = vrot.slane %v6839_v10, 5  ;;  %v2757_v49 = vrot.slane %v6839_v10, 6 }
 0x3a4   : > { %6841 = vst [vmem:[#allocation61_spill] sm:$0xff] %v5883_v42  ;;  %v3143_v5 = vperm.slane %v3135_v24, %v4910_v0  ;;  %v3159_v21 = vsel %vm756_vm1, %v3127_v28, %v3158_v50  ;;  %v3855_v26 = vsel %vm756_vm1, %v5883_v42, %v3854_v35  ;;  %v2758_v4 = vrot.slane %v6839_v10, 7  ;;  %v6842_v42 = vld [vmem:[#allocation16_spill] sm:$0xff] }
 0x3a5   : > { %v3167_v45 = vperm.slane %v3159_v21, %v4910_v0  ;;  %3890 = vrot.lane.b32.xlu2 %v3855_v26, %s4713_s24  ;;  %v2812_v33 = vperm.slane %v6839_v10, 0  ;;  %v2813_v58 = vperm.slane %v2752_v54, 0  ;;  %v2814_v56 = vperm.slane %v2753_v14, 0  ;;  %v6843_v21 = vld [vmem:[#allocation11_spill] sm:$0xff]  ;;  %v6845_v10 = vld [vmem:[#allocation17_spill] sm:$0xff] }
 0x3a6   : > { %v3186_v8 = vrot.slane %v3143_v5, 4  ;;  %v2815_v31 = vperm.slane %v2754_v40, 0  ;;  %v2816_v24 = vperm.slane %v2755_v57, 0  ;;  %v2817_v50 = vperm.slane %v2756_v1, 0 }
 0x3a7   : > { %v3184_v16 = vrot.slane %v3167_v45, 4  ;;  %v2818_v53 = vperm.slane %v2757_v49, 0  ;;  %v2819_v22 = vperm.slane %v2758_v4, 0  ;;  %v5904_v43 = vadd.f32 %v2812_v33, %v6842_v42  ;;  %v6846_v49 = vld [vmem:[#allocation12_spill] sm:$0xff] }
 0x3a8   : > { %v3187_v35 = vsel %vm756_vm1, %v3167_v45, %v3186_v8  ;;  %v5907_v26 = vadd.f32 %v2813_v58, %v6843_v21  ;;  %v5910_v34 = vadd.f32 %v2814_v56, %v6844_v12  ;;  %v5915_v54 = vadd.f32 %v2815_v31, %v6845_v10  ;;  %v6847_v8 = vld [vmem:[#allocation10_spill] sm:$0xff]  ;;  %v6849_v12 = vld [vmem:[#allocation13_spill] sm:$0xff] }
 0x3a9   : > { %3942 = vrot.lane.b32.xlu1 %v3187_v35, %s4715_s30  ;;  %v3185_v57 = vsel %vm756_vm1, %v3184_v16, %v3143_v5  ;;  %v5918_v14 = vadd.f32 %v2816_v24, %v6846_v49  ;;  %v5921_v45 = vadd.f32 %v2817_v50, %v6847_v8  ;;  %v6848_v58 = vld [vmem:[#allocation18_spill] sm:$0xff]  ;;  %v5928_v56 = vadd.f32 %v2819_v22, %v6849_v12 }
 0x3aa   : > { %3910 = vrot.lane.b32.xlu0 %v3185_v57, %s4714_s27  ;;  %v5925_v42 = vadd.f32 %v2818_v53, %v6848_v58  ;;  %v3420_v40 = vrot.slane %v5910_v34, 4  ;;  %v3132_v16 = vrot.slane %v3103_v7, 4  ;;  %v3432_v31 = vrot.slane %v5915_v54, 4 }
 0x3ab   : > { %v3156_v1 = vrot.slane %v3127_v28, 4  ;;  %v3020_v5 = vrot.slane %v5701_v46, 4  ;;  %v3044_v4 = vrot.slane %v5708_v25, 4  ;;  %v3456_v24 = vrot.slane %v5928_v56, 4 }
 0x3ac   : > { %v3421_v33 = vsel %vm756_vm1, %v3420_v40, %v5904_v43  ;;  %v3444_v53 = vrot.slane %v5925_v42, 4  ;;  %v3133_v22 = vsel %vm756_vm1, %v3132_v16, %v3091_v60  ;;  %v3433_v7 = vsel %vm756_vm1, %v3432_v31, %v5907_v26 }
 0x3ad   : > { %v3427_v50 = vperm.slane %v3421_v33, %v4904_v44  ;;  %v5943_v28 = vperm.slane %v3133_v22, %v4910_v0  ;;  %v3157_v46 = vsel %vm756_vm1, %v3156_v1, %v3115_v30  ;;  %v5948_v25 = vperm.slane %v5850_v41, %v4904_v44  ;;  %v273_v33 = vld [vmem:[%s5960_s10 + $0x38] sm:$0xff] }
 0x3ae   : > { %v3439_v35 = vperm.slane %v3433_v7, %v4904_v44  ;;  %v3445_v21 = vsel %vm756_vm1, %v3444_v53, %v5918_v14  ;;  %v3457_v60 = vsel %vm756_vm1, %v3456_v24, %v5921_v45  ;;  %v5964_v41 = vperm.slane %v3157_v46, %v4910_v0  ;;  %4388 = vmatpush.xpose.msk.msra.mxu0 %vm282_vm0, %v273_v33 }
 0x3af   : > { %v3451_v30 = vperm.slane %v3445_v21, %v4904_v44  ;;  %v3470_v57 = vrot.slane %v3427_v50, 4  ;;  %v3182_v10 = vrot.slane %v5943_v28, 4  ;;  %v3463_v49 = vperm.slane %v3457_v60, %v4904_v44  ;;  %4410 = vmatpush.xpose.msk.msra.mxu2 %vm282_vm0, %v273_v33 }
 0x3b0   : > { %v3021_v8 = vsel %vm756_vm1, %v3020_v5, %v5692_v48  ;;  %v3045_v58 = vsel %vm756_vm1, %v3044_v4, %v5704_v51  ;;  %v3807_v12 = vsel %vm756_vm1, %v5747_v59, %v3806_v23  ;;  %v6850_v59 = vrot.slane %v5767_v38, 4  ;;  %v6892_v4 = vld [vmem:[#allocation56_spill] sm:$0xff] }
 0x3b1   : > { %v3471_v40 = vsel %vm756_vm1, %v3439_v35, %v3470_v57  ;;  %v3494_v16 = vrot.slane %v3451_v30, 4  ;;  %v3183_v31 = vsel %vm756_vm1, %v5964_v41, %v3182_v10  ;;  %v5978_v1 = vperm.slane %v3021_v8, %v4910_v0 }
 0x3b2   : > { %v3479_v48 = vperm.slane %v3471_v40, %v4910_v0  ;;  %3878 = vrot.lane.b32.xlu2 %v3183_v31, %s4713_s24  ;;  %v5985_v51 = vperm.slane %v3807_v12, %v4910_v0  ;;  %v3831_v23 = vsel %vm756_vm1, %v5842_v6, %v6850_v59  ;;  %v3468_v22 = vrot.slane %v3439_v35, 4 }
 0x3b3   : > { %v3495_v5 = vsel %vm756_vm1, %v3463_v49, %v3494_v16  ;;  %v3070_v24 = vrot.slane %v5978_v1, 4  ;;  %v5998_v21 = vperm.slane %v3045_v58, %v4910_v0  ;;  %v3839_v38 = vperm.slane %v3831_v23, %v4910_v0  ;;  %v6891_v23 = vld [vmem:[#allocation53_spill] sm:$0xff] }
 0x3b4   : > { %v3503_v7 = vperm.slane %v3495_v5, %v4910_v0  ;;  %v3522_v46 = vrot.slane %v3479_v48, 4  ;;  %v3858_v6 = vrot.slane %v5985_v51, 4  ;;  %v3469_v60 = vsel %vm756_vm1, %v3468_v22, %v3427_v50 }
 0x3b5   : > { %v3492_v57 = vrot.slane %v3463_v49, 4  ;;  %v3198_v10 = vrot.slane %v5579_v15, 4  ;;  %v3071_v12 = vsel %vm756_vm1, %v5998_v21, %v3070_v24  ;;  %v6008_v40 = vperm.slane %v3469_v60, %v4910_v0 }
 0x3b6   : > { %v3523_v35 = vsel %vm756_vm1, %v3503_v7, %v3522_v46  ;;  %v3520_v8 = vrot.slane %v3503_v7, 4  ;;  %v3210_v49 = vrot.slane %v5582_v27, 4  ;;  %v3222_v15 = vrot.slane %v5596_v9, 4  ;;  %v271_v46 = vld [vmem:[%s5960_s10 + $0x28] sm:$0xff] }
 0x3b7   : > { %3948 = vrot.lane.b32.xlu1 %v3523_v35, %s4715_s30  ;;  %v3493_v58 = vsel %vm756_vm1, %v3492_v57, %v3451_v30  ;;  %v3199_v50 = vsel %vm756_vm1, %v5571_v52, %v3198_v10  ;;  %v3859_v31 = vsel %vm756_vm1, %v3839_v38, %v3858_v6  ;;  %v3518_v59 = vrot.slane %v6008_v40, 4 }
 0x3b8   : > { %v3521_v16 = vsel %vm756_vm1, %v3520_v8, %v3479_v48  ;;  %v6019_v33 = vperm.slane %v3493_v58, %v4910_v0  ;;  %v6024_v30 = vperm.slane %v3199_v50, %v4904_v44  ;;  %v3211_v52 = vsel %vm756_vm1, %v5576_v29, %v3210_v49  ;;  %v272_v48 = vld [vmem:[%s5960_s10 + $0x30] sm:$0xff] }
 0x3b9   : > { %3916 = vrot.lane.b32.xlu0 %v3521_v16, %s4714_s27  ;;  %v3223_v27 = vsel %vm756_vm1, %v5585_v20, %v3222_v15  ;;  %v3234_v9 = vrot.slane %v5602_v63, 4  ;;  %v6036_v24 = vperm.slane %v3211_v52, %v4904_v44  ;;  %v3856_v22 = vrot.slane %v3839_v38, 4  ;;  %4389 = vmatpush.xpose.msk.msra.mxu0 %vm282_vm0, %v272_v48 }
 0x3ba   : > { %v3519_v5 = vsel %vm756_vm1, %v6019_v33, %v3518_v59  ;;  %4411 = vmatpush.xpose.msk.msra.mxu2 %vm282_vm0, %v272_v48  ;;  %v6042_v29 = vperm.slane %v3223_v27, %v4904_v44  ;;  %v3246_v63 = vrot.slane %v5618_v19, 4  ;;  %v3270_v7 = vrot.slane %v5634_v36, 4  ;;  %v6854_v27 = vld [vmem:[#allocation23_spill] sm:$0xff] }
 0x3bb   : > { %3884 = vrot.lane.b32.xlu2 %v3519_v5, %s4713_s24  ;;  %v3235_v20 = vsel %vm756_vm1, %v5588_v62, %v3234_v9  ;;  %v3256_v38 = vrot.slane %v6036_v24, 4  ;;  %v3534_v60 = vrot.slane %v5418_v47, 4  ;;  %v3546_v57 = vrot.slane %v5421_v13, 4  ;;  %v270_v5 = vld [vmem:[%s5960_s10 + $0x20] sm:$0xff] }
 0x3bc   : > { %v6050_v6 = vperm.slane %v3235_v20, %v4904_v44  ;;  %v3247_v10 = vsel %vm756_vm1, %v5612_v32, %v3246_v63  ;;  %v3271_v62 = vsel %vm756_vm1, %v5625_v37, %v3270_v7  ;;  %v3558_v19 = vrot.slane %v5430_v55, 4  ;;  %v6852_v37 = vld [vmem:[#allocation21_spill] sm:$0xff] }
 0x3bd   : > { %v3570_v36 = vrot.slane %v5433_v61, 4  ;;  %v3257_v35 = vsel %vm756_vm1, %v3256_v38, %v6024_v30  ;;  %v3255_v58 = vperm.slane %v3247_v10, %v4910_v0  ;;  %v3279_v47 = vperm.slane %v3271_v62, %v4910_v0  ;;  %4390 = vmatpush.xpose.msk.msra.mxu0 %vm282_vm0, %v271_v46  ;;  %v6851_v61 = vld [vmem:[#allocation20_spill] sm:$0xff] }
 0x3be   : > { %v3280_v8 = vrot.slane %v6050_v6, 4  ;;  %4412 = vmatpush.xpose.msk.msra.mxu2 %vm282_vm0, %v271_v46  ;;  %v6070_v13 = vperm.slane %v3257_v35, %v4910_v0  ;;  %v3857_v55 = vsel %vm756_vm1, %v3856_v22, %v5985_v51  ;;  %v3535_v32 = vsel %vm756_vm1, %v6851_v61, %v3534_v60 }
 0x3bf   : > { %3954 = vrot.lane.b32.xlu1 %v3859_v31, %s4715_s30  ;;  %v3547_v50 = vsel %vm756_vm1, %v6852_v37, %v3546_v57  ;;  %v3296_v15 = vrot.slane %v3279_v47, 4  ;;  %v6853_v31 = vld [vmem:[#allocation22_spill] sm:$0xff]  ;;  %v6090_v52 = vperm.slane %v3535_v32, %v4904_v44  ;;  %v3571_v9 = vsel %vm756_vm1, %v6854_v27, %v3570_v36  ;;  %v269_v57 = vld [vmem:[%s5960_s10 + $0x18] sm:$0xff] }
 0x3c0   : > { %v3281_v49 = vsel %vm756_vm1, %v3280_v8, %v6042_v29  ;;  %v6081_v16 = vperm.slane %v3547_v50, %v4904_v44  ;;  %v3559_v59 = vsel %vm756_vm1, %v6853_v31, %v3558_v19  ;;  %v3298_v48 = vrot.slane %v3255_v58, 4  ;;  %v6856_v8 = vld [vmem:[#allocation24_spill] sm:$0xff]  ;;  %v6859_v50 = vld [vmem:[#allocation43_spill] sm:$0xff] }
 0x3c1   : > { %3876 = vrot.lane.b32.xlu0 %v3071_v12, %s4713_s24  ;;  %v6087_v51 = vperm.slane %v3281_v49, %v4910_v0  ;;  %v3297_v22 = vsel %vm756_vm1, %v3296_v15, %v3255_v58  ;;  %v6097_v20 = vperm.slane %v3571_v9, %v4904_v44  ;;  %v3582_v12 = vrot.slane %v5457_v18, 4  ;;  %4391 = vmatpush.xpose.msk.msra.mxu0 %vm282_vm0, %v270_v5  ;;  %v6860_v15 = vld [vmem:[#allocation46_spill] sm:$0xff] }
 0x3c2   : > { %v3592_v63 = vrot.slane %v6081_v16, 4  ;;  %4413 = vmatpush.xpose.msk.msra.mxu2 %vm282_vm0, %v270_v5  ;;  %v6106_v46 = vperm.slane %v3559_v59, %v4904_v44  ;;  %v3606_v38 = vrot.slane %v5464_v39, 4  ;;  %v2974_v60 = vrot.slane %v5661_v11, 4 }
 0x3c3   : > { %v3300_v7 = vrot.slane %v6087_v51, 4  ;;  %3912 = vrot.lane.b32.xlu2 %v3297_v22, %s4714_s27  ;;  %v3616_v10 = vrot.slane %v6097_v20, 4  ;;  %v6113_v18 = vsel %vm756_vm1, %v3279_v47, %v3298_v48  ;;  %v3583_v62 = vsel %vm756_vm1, %v5450_v2, %v3582_v12  ;;  %v6861_v48 = vld [vmem:[#allocation47_spill] sm:$0xff]  ;;  %v6862_v12 = vld [vmem:[#allocation44_spill] sm:$0xff] }
 0x3c4   : > { %v6855_v19 = vrot.slane %v5664_v3, 4  ;;  %v3593_v39 = vsel %vm756_vm1, %v3592_v63, %v6090_v52  ;;  %v3591_v11 = vperm.slane %v3583_v62, %v4910_v0  ;;  %v3607_v58 = vsel %vm756_vm1, %v6856_v8, %v3606_v38  ;;  %v6857_v3 = vld [vmem:[#allocation42_spill] sm:$0xff]  ;;  %v6863_v38 = vld [vmem:[#allocation45_spill] sm:$0xff]  ;;  %v6864_v8 = vld [vmem:[#allocation48_spill] sm:$0xff] }
 0x3c5   : > { %v3301_v35 = vsel %vm756_vm1, %v3300_v7, %v6070_v13  ;;  %v3617_v47 = vsel %vm756_vm1, %v3616_v10, %v6106_v46  ;;  %v3615_v2 = vperm.slane %v3607_v58, %v4910_v0  ;;  %v2975_v61 = vsel %vm756_vm1, %v6857_v3, %v2974_v60  ;;  %4392 = vmatpush.xpose.msk.msra.mxu0 %vm282_vm0, %v269_v57 }
 0x3c6   : > { %v2987_v36 = vsel %vm756_vm1, %v5667_v17, %v6855_v19  ;;  %v6139_v32 = vperm.slane %v3617_v47, %v4910_v0  ;;  %v6142_v37 = vperm.slane %v2975_v61, %v4904_v44  ;;  %v2998_v49 = vrot.slane %v6859_v50, 4  ;;  %4414 = vmatpush.xpose.msk.msra.mxu2 %vm282_vm0, %v269_v57  ;;  %v268_v57 = vld [vmem:[%s5960_s10 + $0x10] sm:$0xff]  ;;  %v6865_v47 = vld [vmem:[#allocation25_spill] sm:$0xff]  ;;  %v6866_v61 = vld [vmem:[#allocation28_spill] sm:$0xff] }
 0x3c7   : > { %v6134_v17 = vperm.slane %v2987_v36, %v4904_v44  ;;  %3976 = vrot.lane.b32.xlu1 %v3301_v35, %s4716_s6  ;;  %v3010_v31 = vrot.slane %v6860_v15, 4  ;;  %v3632_v59 = vrot.slane %v3615_v2, 4  ;;  %v3634_v9 = vrot.slane %v3591_v11, 4 }
 0x3c8   : > { %v3074_v5 = vrot.slane %v6861_v48, 4  ;;  %v6151_v22 = vperm.slane %v3593_v39, %v4910_v0  ;;  %v3636_v63 = vrot.slane %v6139_v32, 4  ;;  %v2999_v7 = vsel %vm756_vm1, %v6862_v12, %v2998_v49  ;;  %v267_v49 = vld [vmem:[%s5960_s10 + $0x8] sm:$0xff] }
 0x3c9   : > { %6858 = vst [vmem:[#allocation16_spill] sm:$0xff] %v6134_v17  ;;  %v3032_v27 = vrot.slane %v6134_v17, 4  ;;  %3922 = vrot.lane.b32.xlu0 %v3857_v55, %s4714_s27  ;;  %v3011_v60 = vsel %vm756_vm1, %v6863_v38, %v3010_v31  ;;  %v3633_v10 = vsel %vm756_vm1, %v3632_v59, %v3591_v11  ;;  %4393 = vmatpush.xpose.msk.msra.mxu0 %vm282_vm0, %v268_v57  ;;  %v3310_v3 = vrot.slane %v6865_v47, 4  ;;  %v6867_v31 = vld [vmem:[#allocation27_spill] sm:$0xff]  ;;  %v6868_v59 = vld [vmem:[#allocation30_spill] sm:$0xff] }
 0x3ca   : > { %v6161_v62 = vperm.slane %v3011_v60, %v4904_v44  ;;  %v3637_v19 = vsel %vm756_vm1, %v3636_v63, %v6151_v22  ;;  %v6170_v36 = vperm.slane %v2999_v7, %v4904_v44  ;;  %v6174_v39 = vsel %vm756_vm1, %v3615_v2, %v3634_v9  ;;  %4415 = vmatpush.xpose.msk.msra.mxu2 %vm282_vm0, %v268_v57  ;;  %v6870_v2 = vld [vmem:[#allocation31_spill] sm:$0xff]  ;;  %v6871_v63 = vld [vmem:[#allocation34_spill] sm:$0xff]  ;;  %v6873_v60 = vld [vmem:[#allocation29_spill] sm:$0xff] }
 0x3cb   : > { %v3033_v55 = vsel %vm756_vm1, %v3032_v27, %v6142_v37  ;;  %3918 = vrot.lane.b32.xlu2 %v3633_v10, %s4714_s27  ;;  %v3075_v58 = vsel %vm756_vm1, %v6864_v8, %v3074_v5  ;;  %v3322_v50 = vrot.slane %v6866_v61, 4  ;;  %v6869_v27 = vrot.slane %v6868_v59, 4  ;;  %v6872_v7 = vld [vmem:[#allocation26_spill] sm:$0xff]  ;;  %v6876_v61 = vld [vmem:[#allocation32_spill] sm:$0xff]  ;;  %s4405_s27 = sshll.u32 %s4693_s18, 3 }
 0x3cc   : > { %v3039_v35 = vperm.slane %v3033_v55, %v4910_v0  ;;  %v3056_v11 = vrot.slane %v6161_v62, 4  ;;  %v3334_v9 = vrot.slane %v6870_v2, 4  ;;  %v3346_v12 = vrot.slane %v6871_v63, 4  ;;  %v6874_v57 = vld [vmem:[#allocation38_spill] sm:$0xff]  ;;  %v6881_v63 = vld [vmem:[#allocation33_spill] sm:$0xff] }
 0x3cd   : > { %v3629_v48 = vsel %vm756_vm1, %v6869_v27, %v6867_v31  ;;  %v3311_v38 = vsel %vm756_vm1, %v6872_v7, %v3310_v3  ;;  %v3323_v10 = vsel %vm756_vm1, %v6873_v60, %v3322_v50  ;;  %v3410_v55 = vrot.slane %v6874_v57, 4  ;;  %4394 = vmatpush.xpose.msk.msra.mxu0 %vm282_vm0, %v267_v49  ;;  %v6877_v31 = vld [vmem:[#allocation35_spill] sm:$0xff]  ;;  %v6878_v3 = vld [vmem:[#allocation37_spill] sm:$0xff] }
 0x3ce   : > { %v3078_v15 = vrot.slane %v3039_v35, 4  ;;  %v3057_v5 = vsel %vm756_vm1, %v3056_v11, %v6170_v36  ;;  %v6200_v47 = vperm.slane %v3323_v10, %v4904_v44  ;;  %v3335_v11 = vsel %vm756_vm1, %v6876_v61, %v3334_v9  ;;  %v6882_v7 = vld [vmem:[#allocation39_spill] sm:$0xff]  ;;  %v6883_v60 = vld [vmem:[#allocation49_spill] sm:$0xff]  ;;  %4416 = vmatpush.xpose.msk.msra.mxu2 %vm282_vm0, %v267_v49  ;;  %v6889_v49 = vld [vmem:[#allocation52_spill] sm:$0xff] }
 0x3cf   : > { %3982 = vrot.lane.b32.xlu1 %v3637_v19, %s4716_s6  ;;  %v3063_v8 = vperm.slane %v3057_v5, %v4910_v0  ;;  %v6879_v59 = vrot.slane %v6878_v3, 4  ;;  %v3887_v27 = vpop.permute.xlu1 %3886  ;;  %v6209_v2 = vperm.slane %v3311_v38, %v4904_v44  ;;  %v6212_v19 = vperm.slane %v3335_v11, %v4904_v44  ;;  %v6887_v11 = vld [vmem:[#allocation36_spill] sm:$0xff] }
 0x3d0   : > { %6875 = vst [vmem:[#allocation11_spill] sm:$0xff] %v6200_v47  ;;  %v3347_v5 = vsel %vm756_vm1, %v6881_v63, %v3346_v12  ;;  %v6884_v10 = vrot.slane %v6883_v60, 4  ;;  %v6224_v57 = vsel %vm4092_vm2, %v3629_v48, %v3887_v27  ;;  %v3368_v61 = vrot.slane %v6200_v47, 4  ;;  %v6888_v63 = vld [vmem:[#allocation51_spill] sm:$0xff]  ;;  %v4607_v47 = vld [vmem:[%s4845_s11] sm:$0xff] }
 0x3d1   : > { %v3405_v50 = vsel %vm756_vm1, %v6879_v59, %v6877_v31  ;;  %6880 = vst [vmem:[#allocation9_spill] sm:$0xff] %v6209_v2  ;;  %3944 = vrot.lane.b32.xlu0 %v6113_v18, %s4715_s30  ;;  %v6227_v38 = vperm.slane %v3347_v5, %v4904_v44  ;;  %v3411_v12 = vsel %vm756_vm1, %v6887_v11, %v3410_v55  ;;  %v266_v31 = vld [vmem:[%s5960_s10] sm:$0xff]  ;;  %v3076_v3 = vrot.slane %v3063_v8, 4 }
 0x3d2   : > { %v3705_v9 = vsel %vm756_vm1, %v6884_v10, %v6882_v7  ;;  %6885 = vst [vmem:[#allocation17_spill] sm:$0xff] %v6224_v57  ;;  %v6890_v10 = vrot.slane %v6889_v49, 4  ;;  %v3746_v48 = vrot.slane %v6891_v23, 4  ;;  %4395 = vmatpush.xpose.msk.msra.mxu0 %vm282_vm0, %v266_v31  ;;  %v3079_v27 = vsel %vm756_vm1, %v3063_v8, %v3078_v15  ;;  %4417 = vmatpush.xpose.msk.msra.mxu2 %vm282_vm0, %v266_v31  ;;  %v6893_v15 = vld [vmem:[#allocation59_spill] sm:$0xff]  ;;  %v6896_v31 = vld [vmem:[#allocation5_spill] sm:$0xff] }
 0x3d3   : > { %6886 = vst [vmem:[#allocation12_spill] sm:$0xff] %v6227_v38  ;;  %v3711_v59 = vperm.slane %v3705_v9, %v4910_v0  ;;  %3940 = vrot.lane.b32.xlu2 %v3075_v58, %s4715_s30  ;;  %v3369_v55 = vsel %vm756_vm1, %v3368_v61, %v6209_v2  ;;  %v3392_v5 = vrot.slane %v6227_v38, 4  ;;  %v3086_v8 = vrot.slane %v6893_v15, 4  ;;  %v6894_v61 = vld [vmem:[#allocation6_spill] sm:$0xff]  ;;  %v6895_v57 = vld [vmem:[#allocation7_spill] sm:$0xff] }
 0x3d4   : > { %v3729_v18 = vsel %vm756_vm1, %v6890_v10, %v6888_v63  ;;  %v3375_v11 = vperm.slane %v3369_v55, %v4910_v0  ;;  %v6248_v10 = vsel %vm756_vm1, %v3076_v3, %v3039_v35  ;;  %v6252_v53 = vsel %vm756_vm1, %v6892_v4, %v3746_v48  ;;  %v6899_v2 = vld [vmem:[#allocation15_spill] sm:$0xff] }
 0x3d5   : > { %v3735_v9 = vperm.slane %v3729_v18, %v4910_v0  ;;  %v3750_v23 = vrot.slane %v3711_v59, 4  ;;  %v3393_v58 = vsel %vm756_vm1, %v3392_v5, %v6212_v19  ;;  %v3098_v18 = vrot.slane %v6894_v61, 4  ;;  %4396 = vmatmul.msk.f32.vlgmr.msra.gmra.mxu0 %vm282_vm0, %v4607_v47  ;;  %v6897_v5 = vld [vmem:[#allocation60_spill] sm:$0xff]  ;;  %v6898_v61 = vld [vmem:[#allocation14_spill] sm:$0xff] }
 0x3d6   : > { %v3110_v55 = vrot.slane %v6895_v57, 4  ;;  %v3399_v35 = vperm.slane %v3393_v58, %v4910_v0  ;;  %v3414_v3 = vrot.slane %v3375_v11, 4  ;;  %v3122_v48 = vrot.slane %v6896_v31, 4  ;;  %v4608_v58 = vld [vmem:[%s4845_s11 + $0x28] sm:$0xff] }
 0x3d7   : > { %v6264_v4 = vsel %vm756_vm1, %v3735_v9, %v3750_v23  ;;  %4004 = vrot.lane.b32.xlu1 %v3079_v27, %s4717_s8  ;;  %v3087_v15 = vsel %vm756_vm1, %v6897_v5, %v3086_v8  ;;  %v3099_v57 = vsel %vm756_vm1, %v6898_v61, %v3098_v18  ;;  %v3748_v38 = vrot.slane %v3735_v9, 4  ;;  %4401 = vmatmul.msk.f32.vlgmr.msra.gmra.mxu2 %vm282_vm0, %v4608_v58  ;;  %v6900_v18 = vld [vmem:[#allocation8_spill] sm:$0xff] }
 0x3d8   : > { %v3111_v47 = vsel %vm756_vm1, %v6899_v2, %v3110_v55  ;;  %v3415_v23 = vsel %vm756_vm1, %v3399_v35, %v3414_v3  ;;  %v3412_v17 = vrot.slane %v3399_v35, 4  ;;  %v3095_v31 = vperm.slane %v3087_v15, %v4904_v44 }
 0x3d9   : > { %v3107_v27 = vperm.slane %v3099_v57, %v4904_v44  ;;  %3950 = vrot.lane.b32.xlu0 %v6174_v39, %s4715_s30  ;;  %v3119_v8 = vperm.slane %v3111_v47, %v4904_v44  ;;  %v3123_v5 = vsel %vm756_vm1, %v6900_v18, %v3122_v48  ;;  %v6285_v2 = vsel %vm756_vm1, %v3748_v38, %v3711_v59  ;;  %v4609_v18 = vld [vmem:[%s4845_s11 + $0x8] sm:$0xff] }
 0x3da   : > { %v3422_v9 = vrot.slane %v5904_v43, 4  ;;  %v3883_v55 = vpop.permute.xlu0 %3882  ;;  %v6289_v35 = vsel %vm756_vm1, %v3412_v17, %v3375_v11  ;;  %v3131_v3 = vperm.slane %v3123_v5, %v4904_v44  ;;  %v3146_v15 = vrot.slane %v3095_v31, 4 }
 0x3db   : > { %v3144_v61 = vrot.slane %v3107_v27, 4  ;;  %v4096_v39 = vsel %vm4092_vm2, %v3405_v50, %v3883_v55  ;;  %3946 = vrot.lane.b32.xlu2 %v3411_v12, %s4715_s30  ;;  %v3915_v57 = vpop.permute.xlu1 %3914  ;;  %v3170_v48 = vrot.slane %v3119_v8, 4  ;;  %v3434_v43 = vrot.slane %v5907_v26, 4 }
 0x3dc   : > { %v3423_v38 = vsel %vm756_vm1, %v5910_v34, %v3422_v9  ;;  %v6298_v59 = vsel %vm282_vm0, %v4096_v39, %v3915_v57  ;;  %v3147_v17 = vsel %vm756_vm1, %v3107_v27, %v3146_v15  ;;  %v3168_v47 = vrot.slane %v3131_v3, 4  ;;  %v6901_v57 = vld [vmem:[#allocation58_spill] sm:$0xff] }
 0x3dd   : > { %v3145_v11 = vsel %vm756_vm1, %v3144_v61, %v3095_v31  ;;  %v6303_v50 = vperm.slane %v3147_v17, %v4910_v0  ;;  %v3171_v12 = vsel %vm756_vm1, %v3131_v3, %v3170_v48  ;;  %v3431_v34 = vperm.slane %v3423_v38, %v4904_v44  ;;  %4397 = vmatmul.msk.f32.gmra.mxu0 %vm282_vm0, %v4609_v18  ;;  %v4610_v61 = vld [vmem:[%s4845_s11 + $0x30] sm:$0xff]  ;;  %v6903_v48 = vld [vmem:[#allocation50_spill] sm:$0xff] }
 0x3de   : > { %v3151_v58 = vperm.slane %v3145_v11, %v4910_v0  ;;  %v6311_v26 = vperm.slane %v3171_v12, %v4910_v0  ;;  %v3169_v27 = vsel %vm756_vm1, %v3168_v47, %v3119_v8  ;;  %v3435_v31 = vsel %vm756_vm1, %v5915_v54, %v3434_v43 }
 0x3df   : > { %v3446_v5 = vrot.slane %v5918_v14, 4  ;;  %4010 = vrot.lane.b32.xlu1 %v3415_v23, %s4717_s8  ;;  %v3175_v9 = vperm.slane %v3169_v27, %v4910_v0  ;;  %v3443_v55 = vperm.slane %v3435_v31, %v4904_v44  ;;  %v3458_v3 = vrot.slane %v5921_v45, 4  ;;  %4402 = vmatmul.msk.f32.gmra.mxu2 %vm282_vm0, %v4610_v61 }
 0x3e0   : > { %v3482_v15 = vrot.slane %v3431_v34, 4  ;;  %v3192_v39 = vrot.slane %v6311_v26, 4  ;;  %v3190_v54 = vrot.slane %v3151_v58, 4  ;;  %v6902_v14 = vrot.slane %v6901_v57, 4 }
 0x3e1   : > { %v3447_v8 = vsel %vm756_vm1, %v5925_v42, %v3446_v5  ;;  %3972 = vrot.lane.b32.xlu0 %v6248_v10, %s4716_s6  ;;  %v3188_v38 = vrot.slane %v3175_v9, 4  ;;  %v3459_v43 = vsel %vm756_vm1, %v5928_v56, %v3458_v3  ;;  %v3480_v18 = vrot.slane %v3443_v55, 4  ;;  %v6904_v5 = vld [vmem:[#allocation55_spill] sm:$0xff] }
 0x3e2   : > { %v3819_v23 = vsel %vm756_vm1, %v6903_v48, %v6902_v14  ;;  %v3455_v45 = vperm.slane %v3447_v8, %v4904_v44  ;;  %v3483_v17 = vsel %vm756_vm1, %v3443_v55, %v3482_v15  ;;  %v3193_v42 = vsel %vm756_vm1, %v3192_v39, %v6303_v50 }
 0x3e3   : > { %v3467_v11 = vperm.slane %v3459_v43, %v4904_v44  ;;  %v6340_v47 = vperm.slane %v3483_v17, %v4910_v0  ;;  %v6343_v12 = vsel %vm756_vm1, %v3175_v9, %v3190_v54  ;;  %3952 = vrot.lane.b32.xlu2 %v6252_v53, %s4715_s30  ;;  %v3189_v10 = vsel %vm756_vm1, %v3188_v38, %v3151_v58  ;;  %v4611_v54 = vld [vmem:[%s4845_s11 + $0x10] sm:$0xff]  ;;  %v4612_v17 = vld [vmem:[%s4845_s11 + $0x38] sm:$0xff]  ;;  %s4406_s30 = sshll.u32 %s4697_s19, 5 }
 0x3e4   : > { %v3506_v56 = vrot.slane %v3455_v45, 4  ;;  %v6349_v27 = vperm.slane %v3819_v23, %v4910_v0  ;;  %v6905_v44 = vrot.slane %v6904_v5, 4  ;;  %v6906_v9 = vrot.slane %v6903_v48, 4  ;;  %s4240_s5 = sadd.s32 %s4406_s30, %s4405_s27 }
 0x3e5   : > { %v3504_v31 = vrot.slane %v3467_v11, 4  ;;  %v6907_v53 = vrot.slane %v5948_v25, 4  ;;  %v3481_v61 = vsel %vm756_vm1, %v3480_v18, %v3431_v34  ;;  %4398 = vmatmul.msk.f32.gmra.mxu0 %vm282_vm0, %v4611_v54  ;;  %v3258_v38 = vrot.slane %v6024_v30, 4  ;;  %s4407_s18 = sshll.u32 %s4240_s5, 3  ;;  %s4635_s5 = scalar_lea.hbm %s6703_s4, 512 }
 0x3e6   : > { %v3843_v3 = vsel %vm756_vm1, %v5948_v25, %v6905_v44  ;;  %v3817_v15 = vsel %vm756_vm1, %v6906_v9, %v6901_v57  ;;  %v3507_v55 = vsel %vm756_vm1, %v3467_v11, %v3506_v56  ;;  %v3487_v14 = vperm.slane %v3481_v61, %v4910_v0  ;;  %s4242_s10 = scalar_lea.hbm %s6703_s4, %s4407_s18 }
 0x3e7   : > { %v3841_v58 = vsel %vm756_vm1, %v6907_v53, %v6904_v5  ;;  %v6366_v39 = vperm.slane %v3843_v3, %v4910_v0  ;;  %v3823_v8 = vperm.slane %v3817_v15, %v4910_v0  ;;  %v3515_v57 = vperm.slane %v3507_v55, %v4910_v0  ;;  %4016 = vrot.lane.b32.xlu1 %v6264_v4, %s4717_s8  ;;  %v6908_v15 = vld [vmem:[#allocation40_spill] sm:$0xff]  ;;  %v6909_v53 = vld [vmem:[#allocation41_spill] sm:$0xff] }
 0x3e8   : > { %v3505_v25 = vsel %vm756_vm1, %v3504_v31, %v3455_v45  ;;  %v3847_v48 = vperm.slane %v3841_v58, %v4910_v0  ;;  %v3282_v43 = vrot.slane %v6042_v29, 4  ;;  %4403 = vmatmul.msk.f32.gmra.mxu2 %vm282_vm0, %v4612_v17  ;;  %v3526_v56 = vrot.slane %v3487_v14, 4 }
 0x3e9   : > { %v3511_v34 = vperm.slane %v3505_v25, %v4910_v0  ;;  %v3864_v23 = vrot.slane %v6366_v39, 4  ;;  %v3528_v11 = vrot.slane %v3515_v57, 4  ;;  %v3862_v45 = vrot.slane %v3823_v8, 4  ;;  %3978 = vrot.lane.b32.xlu0 %v6289_v35, %s4716_s6 }
 0x3ea   : > { %v3860_v18 = vrot.slane %v3847_v48, 4  ;;  %v3259_v5 = vsel %vm756_vm1, %v6036_v24, %v3258_v38  ;;  %v3283_v30 = vsel %vm756_vm1, %v6050_v6, %v3282_v43  ;;  %v6910_v58 = vrot.slane %v6909_v53, 4  ;;  %v4613_v38 = vld [vmem:[%s4845_s11 + $0x18] sm:$0xff] }
 0x3eb   : > { %v3524_v31 = vrot.slane %v3511_v34, 4  ;;  %v3865_v4 = vsel %vm756_vm1, %v3864_v23, %v6349_v27  ;;  %v3529_v29 = vsel %vm756_vm1, %v3528_v11, %v6340_v47  ;;  %v3527_v44 = vsel %vm756_vm1, %v3511_v34, %v3526_v56  ;;  %v3881_v9 = vpop.permute.xlu1 %3880  ;;  %3974 = vrot.lane.b32.xlu2 %v3189_v10, %s4716_s6 }
 0x3ec   : > { %v3861_v3 = vsel %vm756_vm1, %v3860_v18, %v3823_v8  ;;  %v3267_v35 = vperm.slane %v3259_v5, %v4910_v0  ;;  %v3293_v55 = vsel %vm756_vm1, %v6910_v58, %v6908_v15  ;;  %v3291_v6 = vperm.slane %v3283_v30, %v4910_v0  ;;  %v6914_v30 = vld [vmem:[#allocation19_spill] sm:$0xff] }
 0x3ed   : > { %v3525_v24 = vsel %vm756_vm1, %v3524_v31, %v3487_v14  ;;  %v3863_v61 = vsel %vm756_vm1, %v3847_v48, %v3862_v45  ;;  %v6405_v54 = vsel %vm4092_vm2, %v3293_v55, %v3881_v9  ;;  %v3594_v25 = vrot.slane %v6090_v52, 4  ;;  %4399 = vmatmul.msk.f32.gmra.mxu0 %vm282_vm0, %v4613_v38  ;;  %v4614_v45 = vld [vmem:[%s4845_s11 + $0x20] sm:$0xff]  ;;  %s4719_s11 = smov 56  }
 0x3ee   : > { %v3306_v8 = vrot.slane %v3267_v35, 4  ;;  %v3618_v34 = vrot.slane %v6106_v46, 4  ;;  %v3304_v23 = vrot.slane %v3291_v6, 4  ;;  %v6911_v10 = vrot.slane %v5964_v41, 4 }
 0x3ef   : > { %v3068_v43 = vrot.slane %v5998_v21, 4  ;;  %v3595_v17 = vsel %vm756_vm1, %v6081_v16, %v3594_v25  ;;  %4038 = vrot.lane.b32.xlu1 %v3193_v42, %s4718_s12  ;;  %v6912_v21 = vrot.slane %v6019_v33, 4  ;;  %v3194_v33 = vrot.slane %v6303_v50, 4  ;;  %v6913_v50 = vld [vmem:[#allocation61_spill] sm:$0xff] }
 0x3f0   : > { %v3181_v14 = vsel %vm756_vm1, %v6911_v10, %v5943_v28  ;;  %v3307_v48 = vsel %vm756_vm1, %v3291_v6, %v3306_v8  ;;  %v3619_v52 = vsel %vm756_vm1, %v6097_v20, %v3618_v34  ;;  %v3603_v46 = vperm.slane %v3595_v17, %v4910_v0 }
 0x3f1   : > { %v3627_v41 = vperm.slane %v3619_v52, %v4910_v0  ;;  %v3305_v28 = vsel %vm756_vm1, %v3304_v23, %v3267_v35  ;;  %v6429_v11 = vsel %vm756_vm1, %v6912_v21, %v6008_v40  ;;  %3984 = vrot.lane.b32.xlu0 %v6285_v2, %s4716_s6  ;;  %v6435_v42 = vsel %vm756_vm1, %v3068_v43, %v5978_v1  ;;  %v6920_v21 = vld [vmem:[#allocation11_spill] sm:$0xff] }
 0x3f2   : > { %v3642_v16 = vrot.slane %v3603_v46, 4  ;;  %v3530_v40 = vrot.slane %v6340_v47, 4  ;;  %v6448_v2 = vsel %vm756_vm1, %v6311_v26, %v3194_v33  ;;  %v3706_v31 = vrot.slane %v6882_v7, 4 }
 0x3f3   : > { %v3640_v20 = vrot.slane %v3627_v41, 4  ;;  %3980 = vrot.lane.b32.xlu2 %v3525_v24, %s4716_s6  ;;  %v3852_v5 = vrot.slane %v6913_v50, 4  ;;  %v3302_v26 = vrot.slane %v6070_v13, 4 }
 0x3f4   : > { %v3643_v56 = vsel %vm756_vm1, %v3627_v41, %v3642_v16  ;;  %v6451_v1 = vsel %vm756_vm1, %v3515_v57, %v3530_v40  ;;  %v3707_v47 = vsel %vm756_vm1, %v6883_v60, %v3706_v31  ;;  %v3058_v60 = vrot.slane %v6170_v36, 4 }
 0x3f5   : > { %v6440_v18 = vsel %vm756_vm1, %v3640_v20, %v3603_v46  ;;  %4400 = vmatmul.msk.f32.gmra.mxu0 %vm282_vm0, %v4614_v45  ;;  %v3303_v7 = vsel %vm756_vm1, %v6087_v51, %v3302_v26  ;;  %v3715_v9 = vperm.slane %v3707_v47, %v4910_v0  ;;  %v6916_v51 = vld [vmem:[#allocation54_spill] sm:$0xff] }
 0x3f7   : > { %4044 = vrot.lane.b32.xlu1 %v3529_v29, %s4718_s12  ;;  %v3853_v29 = vsel %vm756_vm1, %v3852_v5, %v6914_v30  ;;  %v3754_v6 = vrot.slane %v3715_v9, 4  ;;  %v3866_v5 = vrot.slane %v6349_v27, 4 }
 0x3f9   : > { %4006 = vrot.lane.b32.xlu0 %v6343_v12, %s4717_s8  ;;  %v6915_v12 = vld [vmem:[#allocation57_spill] sm:$0xff]  ;;  %v3909_v8 = vpop.permute.xlu1 %3908 }
 0x3fa   : > { %v3740_v13 = vrot.slane %v6915_v12, 4 }
 0x3fb   : > { %3986 = vrot.lane.b32.xlu2 %v3861_v3, %s4716_s6  ;;  %v3059_v3 = vsel %vm756_vm1, %v6161_v62, %v3058_v60  ;;  %s4243_s6 = sshll.u32 %s6596_s23, 4  ;;  %s4244_s6 = int_to_ptr.vmem [resolvable:$true] %s4243_s6 }
 0x3fc   : > { %v3741_v53 = vsel %vm756_vm1, %v3740_v13, %v6916_v51  ;;  %v3067_v55 = vperm.slane %v3059_v3, %v4910_v0 }
 0x3fe   : > { %v3080_v38 = vrot.slane %v3067_v55, 4 }
 0x3ff   : > { %4050 = vrot.lane.b32.xlu1 %v3865_v4, %s4718_s12  ;;  %v3891_v57 = vpop.permute.xlu2 %3890  ;;  %v3638_v4 = vrot.slane %v6151_v22, 4  ;;  %v3034_v22 = vrot.slane %v6142_v37, 4  ;;  %v6917_v37 = vld [vmem:[#allocation16_spill] sm:$0xff] }
 0x400   : > { %v6466_v35 = vsel %vm4092_vm2, %v3853_v29, %v3891_v57  ;;  %v6921_v29 = vld [vmem:[#allocation17_spill] sm:$0xff] }
 0x401   : > { %4012 = vrot.lane.b32.xlu0 %v3527_v44, %s4717_s8  ;;  %v3730_v44 = vrot.slane %v6888_v63, 4  ;;  %v3639_v58 = vsel %vm756_vm1, %v6139_v32, %v3638_v4  ;;  %v3394_v63 = vrot.slane %v6212_v19, 4  ;;  %v3035_v34 = vsel %vm756_vm1, %v6917_v37, %v3034_v22 }
 0x402   : > { %v3043_v43 = vperm.slane %v3035_v34, %v4910_v0 }
 0x403   : > { %4008 = vrot.lane.b32.xlu2 %v3303_v7, %s4717_s8  ;;  %v3731_v62 = vsel %vm756_vm1, %v6889_v49, %v3730_v44  ;;  %v6918_v49 = vld [vmem:[#allocation12_spill] sm:$0xff] }
 0x404   : > { %v3739_v24 = vperm.slane %v3731_v62, %v4910_v0  ;;  %v3395_v10 = vsel %vm756_vm1, %v6918_v49, %v3394_v63  ;;  %v3081_v17 = vsel %vm756_vm1, %v3080_v38, %v3043_v43  ;;  %v3082_v40 = vrot.slane %v3043_v43, 4 }
 0x405   : > { %v3403_v52 = vperm.slane %v3395_v10, %v4910_v0 }
 0x406   : > { %v3752_v32 = vrot.slane %v3739_v24, 4  ;;  %v3755_v23 = vsel %vm756_vm1, %v3739_v24, %v3754_v6 }
 0x407   : > { %4072 = vrot.lane.b32.xlu1 %v3307_v48, %s4719_s11  ;;  %v6919_v48 = vld [vmem:[#allocation9_spill] sm:$0xff] }
 0x408   : > { %v3753_v19 = vsel %vm756_vm1, %v3752_v32, %v3715_v9 }
 0x409   : > { %v3889_v15 = vpop.permute.xlu0 %3888  ;;  %4018 = vrot.lane.b32.xlu0 %v3863_v61, %s4717_s8  ;;  %v3921_v46 = vpop.permute.xlu1 %3920 }
 0x40a   : > { %v4099_v36 = vsel %vm4092_vm2, %v3741_v53, %v3889_v15 }
 0x40b   : > { %4014 = vrot.lane.b32.xlu2 %v3639_v58, %s4717_s8  ;;  %v4107_v57 = vsel %vm282_vm0, %v4099_v36, %v3921_v46  ;;  %s4245_s8 = sshll.u32 %s4242_s10, 4  ;;  %s4246_s8 = int_to_ptr.hbm [resolvable:$true] %s4245_s8 }
 0x40c   : > { %v3879_v61 = vpop.permute.xlu2 %3878 }
 0x40d   : > { %v4094_v25 = vsel %vm4092_vm2, %v3181_v14, %v3879_v61  ;;  %v3370_v14 = vrot.slane %v6919_v48, 4 }
 0x40f   : > { %4078 = vrot.lane.b32.xlu1 %v3643_v56, %s4719_s11  ;;  %v3371_v16 = vsel %vm756_vm1, %v6920_v21, %v3370_v14  ;;  %v3416_v56 = vrot.slane %v3403_v52, 4 }
 0x410   : > { %v3379_v33 = vperm.slane %v3371_v16, %v4910_v0  ;;  %v3867_v0 = vsel %vm756_vm1, %v6366_v39, %v3866_v5 }
 0x411   : > { %4040 = vrot.lane.b32.xlu0 %v3305_v28, %s4718_s12 }
 0x412   : > { %v3417_v28 = vsel %vm756_vm1, %v3416_v56, %v3379_v33  ;;  %v3418_v26 = vrot.slane %v3379_v33, 4 }
 0x413   : > { %4036 = vrot.lane.b32.xlu2 %v3081_v17, %s4718_s12 }
 0x415   : > { %v3885_v41 = vpop.permute.xlu2 %3884 }
 0x416   : > { %v4097_v20 = vsel %vm4092_vm2, %v6429_v11, %v3885_v41 }
 0x419   : > { %4046 = vrot.lane.b32.xlu0 %v6440_v18, %s4718_s12  ;;  %v3083_v18 = vsel %vm756_vm1, %v3067_v55, %v3082_v40 }
 0x41b   : > { %4042 = vrot.lane.b32.xlu2 %v3417_v28, %s4718_s12  ;;  %v3943_v47 = vpop.permute.xlu1 %3942 }
 0x41c   : > { %v3911_v45 = vpop.permute.xlu0 %3910 }
 0x41d   : > { %v4102_v31 = vsel %vm282_vm0, %v4094_v25, %v3911_v45  ;;  %v3913_v50 = vpop.permute.xlu2 %3912 }
 0x41e   : > { %v6520_v11 = vsel %vm282_vm0, %v6405_v54, %v3913_v50  ;;  %v3419_v54 = vsel %vm756_vm1, %v3403_v52, %v3418_v26  ;;  %v4111_v12 = vsel %vm4109_vm3, %v4102_v31, %v3943_v47 }
 0x421   : > { %4068 = vrot.lane.b32.xlu0 %v3083_v18, %s4719_s11 }
 0x423   : > { %4048 = vrot.lane.b32.xlu2 %v3753_v19, %s4718_s12  ;;  %s4229_s12 = scalar_lea.sflag [#allocation3], %s237_s13 }
 0x425   : > { %v3919_v30 = vpop.permute.xlu2 %3918 }
 0x426   : > { %v6530_v27 = vsel %vm282_vm0, %v6921_v29, %v3919_v30 }
 0x429   : > { %4074 = vrot.lane.b32.xlu0 %v3419_v54, %s4719_s11  ;;  %v3949_v7 = vpop.permute.xlu1 %3948 }
 0x42b   : > { %v3917_v39 = vpop.permute.xlu0 %3916  ;;  %4070 = vrot.lane.b32.xlu2 %v6448_v2, %s4719_s11 }
 0x42c   : > { %v4105_v60 = vsel %vm282_vm0, %v4097_v20, %v3917_v39 }
 0x42d   : > { %v3941_v13 = vpop.permute.xlu2 %3940  ;;  %v6544_v44 = vsel %vm4109_vm3, %v4105_v60, %v3949_v7 }
 0x431   : > { %4080 = vrot.lane.b32.xlu0 %v3755_v23, %s4719_s11  ;;  %v3955_v4 = vpop.permute.xlu1 %3954 }
 0x433   : > { %v3877_v3 = vpop.permute.xlu0 %3876  ;;  %4076 = vrot.lane.b32.xlu2 %v6451_v1, %s4719_s11 }
 0x434   : > { %v4093_v9 = vsel %vm4092_vm2, %v6435_v42, %v3877_v3 }
 0x435   : > { %v4101_v2 = vsel %vm282_vm0, %v4093_v9, %v3909_v8  ;;  %v3947_v15 = vpop.permute.xlu2 %3946 }
 0x436   : > { %v6548_v51 = vsel %vm4109_vm3, %v4101_v2, %v3941_v13  ;;  %v6552_v53 = vsel %vm4109_vm3, %v6298_v59, %v3947_v15 }
 0x439   : > { %v3977_v36 = vpop.permute.xlu1 %3976 }
 0x43b   : > { %v3923_v22 = vpop.permute.xlu0 %3922  ;;  %4082 = vrot.lane.b32.xlu2 %v3867_v0, %s4719_s11  ;;  %s4629_s11 = sshra.s32 %s4246_s8, 4  ;;  %s4630_s11 = int_to_ptr.hbm [resolvable:$true] %s4629_s11 }
 0x43c   : > { %v4108_v42 = vsel %vm282_vm0, %v6466_v35, %v3923_v22  ;;  %s4631_s14 = scalar_lea.hbm %s4630_s11, 64  ;;  %p4636_p4 = scmp.lt.s32.totalorder %s4630_s11, %s6703_s4 }
 0x43d   : > { %v3953_v1 = vpop.permute.xlu2 %3952  ;;  %v6558_v58 = vsel %vm4109_vm3, %v4108_v42, %v3955_v4  ;;  %p4632_p0 = scmp.ne.s32.totalorder %s4630_s11, %s4631_s14  ;;  %p4637_p5 = scmp.lt.s32.totalorder %s4635_s5, %s4631_s14 }
 0x43e   : > { %v6561_v55 = vsel %vm4109_vm3, %v4107_v57, %v3953_v1 }
 0x43f   : > { %p4633_p1 = pnand %p4632_p0, %p4797_p3  ;;  %p4638_p6 = por %p4637_p5, %p4636_p4 }
 0x441   : > { %v3983_v62 = vpop.permute.xlu1 %3982  ;;  %p4634_p2 = pneg %p4633_p1 }
 0x443   : > { %v3945_v63 = vpop.permute.xlu0 %3944  ;;  %p4639_p7 = pnand %p4638_p6, %p4634_p2 }
 0x444   : > { %v4112_v20 = vsel %vm4109_vm3, %v6520_v11, %v3945_v63 }
 0x445   : > { %v3975_v24 = vpop.permute.xlu2 %3974  ;;  %v4121_v28 = vsel %vm4118_vm4, %v4112_v20, %v3977_v36 }
 0x446   : > { %v4120_v56 = vsel %vm4118_vm4, %v4111_v12, %v3975_v24 }
 0x449   : > { %v6563_v6 = vpop.permute.xlu1 %4004 }
 0x44b   : > { %v3951_v59 = vpop.permute.xlu0 %3950 }
 0x44c   : > { %v4115_v30 = vsel %vm4109_vm3, %v6530_v27, %v3951_v59 }
 0x44d   : > { %v3981_v61 = vpop.permute.xlu2 %3980  ;;  %v4124_v7 = vsel %vm4118_vm4, %v4115_v30, %v3983_v62 }
 0x44e   : > { %v4123_v54 = vsel %vm4118_vm4, %v6544_v44, %v3981_v61 }
 0x451   : > { %v6565_v8 = vpop.permute.xlu1 %4010 }
 0x452   : > { %v6575_v10 = vpop.f32.mrf.mxu0 }
 0x453   : > { %v3973_v25 = vpop.permute.xlu0 %3972 }
 0x454   : > { %v4119_v22 = vsel %vm4118_vm4, %v6548_v51, %v3973_v25 }
 0x455   : > { %v6567_v37 = vpop.permute.xlu2 %3986  ;;  %v4128_v62 = vsel %vm4127_vm5, %v4119_v22, %v6563_v6 }
 0x456   : > { %v4126_v1 = vsel %vm4118_vm4, %v6558_v58, %v6567_v37 }
 0x459   : > { %v6569_v35 = vpop.permute.xlu1 %4016 }
 0x45a   : > { %v4198_v14 = vpop.f32.mrf.mxu0  ;;  %v4210_v33 = vpop.f32.mrf.mxu2 }
 0x45b   : > { %v6571_v34 = vpop.permute.xlu0 %3978 }
 0x45c   : > { %v4122_v6 = vsel %vm4118_vm4, %v6552_v53, %v6571_v34 }
 0x45d   : > { %v4009_v32 = vpop.permute.xlu2 %4008 }
 0x45e   : > { %v4130_v50 = vsel %vm4127_vm5, %v4121_v28, %v4009_v32 }
 0x461   : > { %v4039_v38 = vpop.permute.xlu1 %4038 }
 0x462   : > { %v4201_v41 = vpop.f32.mrf.mxu0  ;;  %v4213_v60 = vpop.f32.mrf.mxu2 }
 0x463   : > { %v6573_v23 = vpop.permute.xlu0 %3984 }
 0x464   : > { %v4125_v53 = vsel %vm4118_vm4, %v6561_v55, %v6573_v23 }
 0x465   : > { %v4015_v49 = vpop.permute.xlu2 %4014 }
 0x466   : > { %v4133_v27 = vsel %vm4127_vm5, %v4124_v7, %v4015_v49  ;;  %v4131_v49 = vsel %vm4127_vm5, %v4122_v6, %v6565_v8  ;;  %v4134_v8 = vsel %vm4127_vm5, %v4125_v53, %v6569_v35 }
 0x469   : > { %v4045_v48 = vpop.permute.xlu1 %4044 }
 0x46a   : > { %v4204_v31 = vpop.f32.mrf.mxu0 }
 0x46b   : > { %v4007_v19 = vpop.permute.xlu0 %4006  ;;  %v4216_v61 = vpop.f32.mrf.mxu2 }
 0x46c   : > { %v4129_v40 = vsel %vm4127_vm5, %v4120_v56, %v4007_v19 }
 0x46d   : > { %v4037_v43 = vpop.permute.xlu2 %4036  ;;  %v4138_v0 = vsel %vm4136_vm6, %v4129_v40, %v4039_v38 }
 0x46e   : > { %v4137_v24 = vsel %vm4136_vm6, %v4128_v62, %v4037_v43 }
 0x471   : > { %v4051_v46 = vpop.permute.xlu1 %4050 }
 0x472   : > { %v4207_v3 = vpop.f32.mrf.mxu0 }
 0x473   : > { %v4013_v17 = vpop.permute.xlu0 %4012 }
 0x474   : > { %v4132_v39 = vsel %vm4127_vm5, %v4123_v54, %v4013_v17 }
 0x475   : > { %v6577_v52 = vpop.permute.xlu2 %4042  ;;  %v4141_v44 = vsel %vm4136_vm6, %v4132_v39, %v4045_v48 }
 0x479   : > { %v4073_v45 = vpop.permute.xlu1 %4072 }
 0x47b   : > { %v4019_v21 = vpop.permute.xlu0 %4018 }
 0x47c   : > { %v4135_v63 = vsel %vm4127_vm5, %v4126_v1, %v4019_v21 }
 0x47d   : > { %v6579_v16 = vpop.permute.xlu2 %4048  ;;  %v4144_v38 = vsel %vm4136_vm6, %v4135_v63, %v4051_v46 }
 0x47e   : > { %v4143_v34 = vsel %vm4136_vm6, %v4134_v8, %v6579_v16 }
 0x481   : > { %v4079_v13 = vpop.permute.xlu1 %4078 }
 0x483   : > { %v4041_v5 = vpop.permute.xlu0 %4040 }
 0x484   : > { %v4139_v11 = vsel %vm4136_vm6, %v4130_v50, %v4041_v5 }
 0x485   : > { %v4148_v47 = vsel %vm4145_vm7, %v4139_v11, %v4073_v45  ;;  %v4071_v18 = vpop.permute.xlu2 %4070 }
 0x486   : > { %v4202_v26 = vadd.f32 %v4201_v41, %v4148_v47  ;;  %v4147_v57 = vsel %vm4145_vm7, %v4138_v0, %v4071_v18 }
 0x487   : > { %v4199_v29 = vadd.f32 %v4198_v14, %v4147_v57 }
 0x488   : > { %4222 = vst.msk [vmem:[%s6596_s23 + $0x10] sm:$0xff] %vm4219_vm8, %v4202_v26 }
 0x489   : > { %4221 = vst.msk [vmem:[%s6596_s23 + $0x8] sm:$0xff] %vm4219_vm8, %v4199_v29 }
 0x48b   : > { %v4047_v12 = vpop.permute.xlu0 %4046 }
 0x48c   : > { %v4142_v4 = vsel %vm4136_vm6, %v4133_v27, %v4047_v12 }
 0x48d   : > { %v4151_v9 = vsel %vm4145_vm7, %v4142_v4, %v4079_v13  ;;  %v4077_v2 = vpop.permute.xlu2 %4076 }
 0x48e   : > { %v4211_v15 = vadd.f32 %v4210_v33, %v4151_v9  ;;  %v4150_v36 = vsel %vm4145_vm7, %v4141_v44, %v4077_v2 }
 0x48f   : > { %v4208_v42 = vadd.f32 %v4207_v3, %v4150_v36 }
 0x490   : > { %4225 = vst.msk [vmem:[%s6596_s23 + $0x28] sm:$0xff] %vm4219_vm8, %v4211_v15 }
 0x491   : > { %4224 = vst.msk [vmem:[%s6596_s23 + $0x20] sm:$0xff] %vm4219_vm8, %v4208_v42 }
 0x493   : > { %v4069_v51 = vpop.permute.xlu0 %4068 }
 0x494   : > { %v4146_v59 = vsel %vm4145_vm7, %v4137_v24, %v4069_v51 }
 0x495   : > { %v4196_v25 = vadd.f32 %v6575_v10, %v4146_v59  ;;  %v4083_v32 = vpop.permute.xlu2 %4082  ;;  %v4140_v10 = vsel %vm4136_vm6, %v4131_v49, %v6577_v52 }
 0x496   : > { %v4153_v58 = vsel %vm4145_vm7, %v4144_v38, %v4083_v32 }
 0x497   : > { %4220 = vst.msk [vmem:[%s6596_s23] sm:$0xff] %vm4219_vm8, %v4196_v25  ;;  %v4217_v37 = vadd.f32 %v4216_v61, %v4153_v58 }
 0x499   : > { %4227 = vst.msk [vmem:[%s6596_s23 + $0x38] sm:$0xff] %vm4219_vm8, %v4217_v37 }
 0x49b   : > { %v4075_v19 = vpop.permute.xlu0 %4074 }
 0x49c   : > { %v4149_v43 = vsel %vm4145_vm7, %v4140_v10, %v4075_v19 }
 0x49d   : > { %v4205_v48 = vadd.f32 %v4204_v31, %v4149_v43 }
 0x49f   : > { %4223 = vst.msk [vmem:[%s6596_s23 + $0x18] sm:$0xff] %vm4219_vm8, %v4205_v48 }
 0x4a3   : > { %v4081_v14 = vpop.permute.xlu0 %4080 }
 0x4a4   : > { %v4152_v17 = vsel %vm4145_vm7, %v4143_v34, %v4081_v14 }
 0x4a5   : > { %v4214_v55 = vadd.f32 %v4213_v60, %v4152_v17 }
 0x4a7   : > { %4226 = vst.msk [vmem:[%s6596_s23 + $0x30] sm:$0xff] %vm4219_vm8, %v4214_v55 }
 0x4a8   : > { %4642 = shalt.err (!%p4639_p7)
}
 0x4a9   : > { %s4720_s13 = smov 128  }
 0x4aa   : > { %4418 = dma.vmem_to_hbm [thread:$0]  (%p4797_p3), %s4244_s6, 1024, %s4246_s8, %s4229_s12, %s4720_s13, %s4720_s13, %s4713_s24  }
 0x4ab PF: > { %p4424_p9 = scmp.ge.s32.totalorder %s4709_s22, 2  ;;  %s4260_s23 = sand.u32 1, %s4681_s15  }
 0x4ac   : > { %s4261_s9 = scalar_lea.sflag [#allocation3], %s4260_s23 }
 0x4ad   : > { %p4421_p10 = pnand %p4424_p9, %p4806_p8 }
 0x4af   : > { %p4422_p11 = pneg %p4421_p10 }
 0x4b1   : > { %4676 = dma.done.wait (%p4422_p11), %s4261_s9, 1024  }
 0x4b2   : > { %4678 = vsyncadd (%p4422_p11), %s4261_s9, 4294966272  ;;  %s17_s22 = sadd.s32 1, %s4709_s22   ;;  %s6922_s15 = smov %s4685_s16 }
 0x4b3   : > { %p14_p12 = scmp.ge.s32.totalorder %s17_s22, 10   ;;  %s6923_s16 = smov %s4689_s17 }
 0x4b4   : > { %s6924_s17 = smov %s4815_s7  ;;  %s6925_s18 = smov %s4701_s20 }
 0x4b5   : > { %s6926_s19 = smov %s4705_s21  ;;  %s6927_s20 = smov %s6930_s25 }
 0x4b6   : > { %s6928_s21 = smov %s6934_s26  ;;  %16 = sbr.rel (!%p14_p12) target bundleno = 5 (0x5), region = 74 }
 0x4bb   :  { %4267 = vsyncpa [#allocation3], 1 }
 0x4bc   :  { %4269 = vsyncpa [#allocation3 + $0x1], 1 }

</bundles_post_ra>
